<compile_context>
chip_gen: v7x
topology: tpu7x:2x2x1
jax: 0.10.0
libtpu: 0.0.40
codegen_flags: <defaults>
</compile_context>

<pallas_src>
import functools

import jax
import jax.numpy as jnp
from jax import lax
from jax.experimental import pallas as pl
from jax.experimental.pallas import tpu as pltpu


def _lstm_kernel(x_ref, h0_ref, c0_ref, wih_ref, whh_ref, b_ref,
                 out_ref, hn_ref, cn_ref, xg_ref):
    """Single-layer LSTM forward over the full sequence (batch=1).

    x_ref   : (T, I)   f32   inputs
    h0_ref  : (1, H)   f32   initial hidden state
    c0_ref  : (1, H)   f32   initial cell state
    wih_ref : (I, 4H)  bf16  input->gates weights, cols (i,f,o,g), i/f/o pre-scaled 0.5
    whh_ref : (H, 4H)  bf16  hidden->gates weights, cols (i,f,o,g), i/f/o pre-scaled 0.5
    b_ref   : (1, 4H)  f32   b_ih + b_hh, cols (i,f,o,g), i/f/o pre-scaled 0.5
    out_ref : (T, H)   f32   per-step hidden states
    hn_ref  : (1, H)   f32   final hidden state
    cn_ref  : (1, H)   f32   final cell state
    xg_ref  : (T, 4H)  f32   VMEM scratch for the hoisted input projection
    """
    T = x_ref.shape[0]
    H = h0_ref.shape[1]

    # W_hh loaded once; reused across all 24 unrolled steps.
    # TODO(synk): if a bundle dump shows per-step RHS re-staging, switch to
    #             pltpu.matmul_push_rhs once + matmul_acc_lhs / matmul_pop per
    #             step (and on v7x accumulate onto the xg row via the MRB).
    whh = whh_ref[...]

    # Hoisted input projection + bias: one bf16 MXU matmul (f32 accumulate),
    # off the serial h-dependent chain.  Staged in VMEM scratch.
    xg_ref[...] = (jnp.dot(x_ref[...].astype(jnp.bfloat16), wih_ref[...],
                           preferred_element_type=jnp.float32)
                   + b_ref[...])

    # Gate order (i,f,o,g) with i/f/o pre-scaled by 0.5 in param prep:
    #   sigmoid(z) = 0.5*tanh(z/2) + 0.5  ->  single full-vreg tanh per step.
    lane = lax.broadcasted_iota(jnp.int32, (1, 4 * H), 1)
    sig_mask = lane < 3 * H

    def step(t, carry):
        h, c = carry
        gates = xg_ref[pl.ds(t, 1), :] + jnp.dot(
            h.astype(jnp.bfloat16), whh,
            preferred_element_type=jnp.float32)                     # (1, 4H) f32
        tg = jnp.tanh(gates)                                        # 1 EUP push
        act = jnp.where(sig_mask, 0.5 * tg + 0.5, tg)
        # TODO(synk): the 4 lane slices below lower to XLU lane selects; if
        #             they become exposed, replace with two pltpu.roll ops.
        i_g = act[:, 0 * H:1 * H]
        f_g = act[:, 1 * H:2 * H]
        o_g = act[:, 2 * H:3 * H]
        g_g = act[:, 3 * H:4 * H]
        c_new = f_g * c + i_g * g_g
        h_new = o_g * jnp.tanh(c_new)
        out_ref[pl.ds(t, 1), :] = h_new
        return (h_new, c_new)

    # seq_len is static and small -> full unroll (static row indices, LLO
    # scheduler visibility across adjacent steps).
    h_fin, c_fin = lax.fori_loop(0, T, step, (h0_ref[...], c0_ref[...]),
                                 unroll=True)
    hn_ref[...] = h_fin
    cn_ref[...] = c_fin


def prepare_encoder_params(w_ih, w_hh, b_ih, b_hh):
    """One-time parameter prep (amortized across calls).

    * Transposes the PyTorch LSTM weights and combines the two biases.
    * Permutes gate blocks from PyTorch order (i, f, g, o) to (i, f, o, g) so
      the kernel splits sigmoid/tanh with one contiguous lane mask.
    * Pre-scales the sigmoid-gate (i/f/o) columns by 0.5 (exact) so the kernel
      needs a single tanh per step.
    * Casts the matmul weights to bf16 (MXU-native); bias stays f32.
    """
    H = w_hh.shape[1]

    def permute_and_scale(m):  # m: (rows, 4H), columns in PyTorch (i,f,g,o) order
        i = m[:, 0 * H:1 * H]
        f = m[:, 1 * H:2 * H]
        g = m[:, 2 * H:3 * H]
        o = m[:, 3 * H:4 * H]
        return jnp.concatenate([0.5 * i, 0.5 * f, 0.5 * o, g], axis=1)

    wih_t = permute_and_scale(
        jnp.transpose(w_ih).astype(jnp.float32)).astype(jnp.bfloat16)   # (I, 4H)
    whh_t = permute_and_scale(
        jnp.transpose(w_hh).astype(jnp.float32)).astype(jnp.bfloat16)   # (H, 4H)
    b = permute_and_scale(
        jnp.reshape(b_ih + b_hh, (1, 4 * H)).astype(jnp.float32))       # (1, 4H) f32
    return wih_t, whh_t, b


@functools.partial(jax.jit, static_argnames=("seq_len",))
def encoder_rnn_forward(x, hn, cn, wih_t, whh_t, b, *, seq_len=24):
    """Mirrors EncoderRNN.forward: x.view(seq_len, 1, input_size) -> LSTM.

    Takes pre-prepared params from prepare_encoder_params().
    Returns (output, (h_n, c_n)) with PyTorch shapes:
      output: (seq_len, 1, H), h_n: (1, 1, H), c_n: (1, 1, H)
    """
    input_size = wih_t.shape[0]
    hidden_size = whh_t.shape[0]

    x2 = jnp.reshape(x, (seq_len, input_size)).astype(jnp.float32)
    h0 = jnp.reshape(hn, (1, hidden_size)).astype(jnp.float32)
    c0 = jnp.reshape(cn, (1, hidden_size)).astype(jnp.float32)

    vmem = pl.BlockSpec(memory_space=pltpu.MemorySpace.VMEM)
    out, h_n, c_n = pl.pallas_call(
        _lstm_kernel,
        out_shape=(
            jax.ShapeDtypeStruct((seq_len, hidden_size), jnp.float32),
            jax.ShapeDtypeStruct((1, hidden_size), jnp.float32),
            jax.ShapeDtypeStruct((1, hidden_size), jnp.float32),
        ),
        in_specs=[vmem] * 6,
        out_specs=(vmem, vmem, vmem),
        scratch_shapes=[pltpu.VMEM((seq_len, 4 * hidden_size), jnp.float32)],
    )(x2, h0, c0, wih_t, whh_t, b)

    output = out.reshape(seq_len, 1, hidden_size)
    return output, (h_n.reshape(1, 1, hidden_size),
                    c_n.reshape(1, 1, hidden_size))


def _lstm_reference(x2, h0, c0, w_ih, w_hh, b_ih, b_hh):
    """Plain-JAX f32 reference matching torch.nn.LSTM semantics (batch=1),
    using the raw PyTorch-layout weights (gate order i,f,g,o)."""
    H = w_hh.shape[1]

    def step(carry, x_t):
        h, c = carry
        gates = x_t @ w_ih.T + h @ w_hh.T + b_ih + b_hh
        i = jax.nn.sigmoid(gates[0 * H:1 * H])
        f = jax.nn.sigmoid(gates[1 * H:2 * H])
        g = jnp.tanh(gates[2 * H:3 * H])
        o = jax.nn.sigmoid(gates[3 * H:4 * H])
        c_new = f * c + i * g
        h_new = o * jnp.tanh(c_new)
        return (h_new, c_new), h_new

    (h_fin, c_fin), outs = lax.scan(step, (h0[0], c0[0]), x2)
    return outs, h_fin, c_fin


if __name__ == "__main__":
    input_size = 16
    hidden_size = 32
    seq_len = 24          # hard-coded in EncoderRNN.__init__
    n_layers = 1

    key = jax.random.PRNGKey(0)
    k_x, k_wih, k_whh, k_bih, k_bhh = jax.random.split(key, 5)

    # Deterministic parameter init (same scheme as torch.nn.LSTM: U(-1/sqrt(H), 1/sqrt(H)))
    bound = 1.0 / (hidden_size ** 0.5)
    w_ih = jax.random.uniform(k_wih, (4 * hidden_size, input_size),
                              jnp.float32, -bound, bound)
    w_hh = jax.random.uniform(k_whh, (4 * hidden_size, hidden_size),
                              jnp.float32, -bound, bound)
    b_ih = jax.random.uniform(k_bih, (4 * hidden_size,), jnp.float32, -bound, bound)
    b_hh = jax.random.uniform(k_bhh, (4 * hidden_size,), jnp.float32, -bound, bound)

    # One-time parameter prep (transpose + bias combine + gate permutation +
    # 0.5 sigmoid pre-scale + bf16 weight cast).
    wih_t, whh_t, b = prepare_encoder_params(w_ih, w_hh, b_ih, b_hh)

    # Example inputs: anything that views to (seq_len, 1, input_size); initHidden() -> zeros.
    x = jax.random.normal(k_x, (seq_len, 1, input_size), jnp.float32)
    hn = jnp.zeros((n_layers, 1, hidden_size), jnp.float32)
    cn = jnp.zeros((n_layers, 1, hidden_size), jnp.float32)

    output, (h_n, c_n) = encoder_rnn_forward(
        x, hn, cn, wih_t, whh_t, b, seq_len=seq_len)
    jax.block_until_ready((output, h_n, c_n))

    # Cross-check against a plain-JAX f32 LSTM reference on the raw weights
    # (also validates the gate permutation + 0.5 pre-scale / single-tanh trick).
    # Tolerance relaxed vs the all-f32 kernel because the MXU operands are bf16.
    ref_out, ref_h, ref_c = _lstm_reference(
        x.reshape(seq_len, input_size), hn.reshape(1, hidden_size),
        cn.reshape(1, hidden_size), w_ih, w_hh, b_ih, b_hh)
    assert jnp.allclose(output[:, 0, :], ref_out, atol=3e-2, rtol=3e-2)
    assert jnp.allclose(h_n[0, 0], ref_h, atol=3e-2, rtol=3e-2)
    assert jnp.allclose(c_n[0, 0], ref_c, atol=3e-2, rtol=3e-2)
    assert output.shape == (seq_len, 1, hidden_size)
    assert h_n.shape == (1, 1, hidden_size) and c_n.shape == (1, 1, hidden_size)

    print("KERNEL_OK")
</pallas_src>

<mosaic_0001>
module attributes {stable_mosaic.version = 11 : i64} {
  func.func @_lstm_kernel(%arg0: memref<24x16xf32, #tpu.memory_space<vmem>>, %arg1: memref<1x32xf32, #tpu.memory_space<vmem>>, %arg2: memref<1x32xf32, #tpu.memory_space<vmem>>, %arg3: memref<16x128xbf16, #tpu.memory_space<vmem>>, %arg4: memref<32x128xbf16, #tpu.memory_space<vmem>>, %arg5: memref<1x128xf32, #tpu.memory_space<vmem>>, %arg6: memref<24x32xf32, #tpu.memory_space<vmem>>, %arg7: memref<1x32xf32, #tpu.memory_space<vmem>>, %arg8: memref<1x32xf32, #tpu.memory_space<vmem>>, %arg9: memref<24x128xf32, #tpu.memory_space<vmem>>) attributes {dimension_semantics = [], scalar_prefetch = 0 : i64, scratch_operands = 1 : i64, tpu.core_type = #tpu.core_type<tc>} {
    %c0 = arith.constant 0 : index
    %c0_0 = arith.constant 0 : index
    %0 = vector.load %arg4[%c0, %c0_0] : memref<32x128xbf16, #tpu.memory_space<vmem>>, vector<32x128xbf16>
    %c0_1 = arith.constant 0 : index
    %c0_2 = arith.constant 0 : index
    %1 = vector.load %arg0[%c0_1, %c0_2] : memref<24x16xf32, #tpu.memory_space<vmem>>, vector<24x16xf32>
    %2 = arith.truncf %1 : vector<24x16xf32> to vector<24x16xbf16>
    %c0_3 = arith.constant 0 : index
    %c0_4 = arith.constant 0 : index
    %3 = vector.load %arg3[%c0_3, %c0_4] : memref<16x128xbf16, #tpu.memory_space<vmem>>, vector<16x128xbf16>
    %cst = arith.constant dense<0.000000e+00> : vector<24x128xf32>
    %4 = tpu.matmul %2, %3, %cst {dimension_numbers = #tpu.dot_dimension_numbers<[1], [0], [0], [1], [0, 0, 1, 1], [], []>} : vector<24x16xbf16>, vector<16x128xbf16>, vector<24x128xf32> -> vector<24x128xf32>
    %c0_5 = arith.constant 0 : index
    %c0_6 = arith.constant 0 : index
    %5 = vector.load %arg5[%c0_5, %c0_6] : memref<1x128xf32, #tpu.memory_space<vmem>>, vector<1x128xf32>
    %6 = vector.broadcast %5 : vector<1x128xf32> to vector<24x128xf32>
    %7 = arith.addf %4, %6 : vector<24x128xf32>
    %c0_7 = arith.constant 0 : index
    %c0_8 = arith.constant 0 : index
    %8 = vector.load %arg9[%c0_7, %c0_8] : memref<24x128xf32, #tpu.memory_space<vmem>>, vector<24x128xf32>
    tpu.vector_store %arg9[%c0_7, %c0_8], %7 {strides = array<i32>} : memref<24x128xf32, #tpu.memory_space<vmem>>, vector<24x128xf32>,
    %9 = tpu.iota {dimensions = array<i32: 1>} : vector<1x128xi32>
    %c96_i32 = arith.constant 96 : i32
    %10 = vector.broadcast %c96_i32 : i32 to vector<1x128xi32>
    %11 = arith.cmpi slt, %9, %10 : vector<1x128xi32>
    %c0_9 = arith.constant 0 : index
    %c0_10 = arith.constant 0 : index
    %12 = vector.load %arg1[%c0_9, %c0_10] : memref<1x32xf32, #tpu.memory_space<vmem>>, vector<1x32xf32>
    %c0_11 = arith.constant 0 : index
    %c0_12 = arith.constant 0 : index
    %13 = vector.load %arg2[%c0_11, %c0_12] : memref<1x32xf32, #tpu.memory_space<vmem>>, vector<1x32xf32>
    %c0_i32 = arith.constant 0 : i32
    %14 = arith.index_cast %c0_i32 : i32 to index
    %c0_13 = arith.constant 0 : index
    %15 = vector.load %arg9[%14, %c0_13] : memref<24x128xf32, #tpu.memory_space<vmem>>, vector<1x128xf32>
    %16 = arith.truncf %12 : vector<1x32xf32> to vector<1x32xbf16>
    %cst_14 = arith.constant dense<0.000000e+00> : vector<1x128xf32>
    %17 = tpu.matmul %16, %0, %cst_14 {dimension_numbers = #tpu.dot_dimension_numbers<[1], [0], [0], [1], [0, 0, 1, 1], [], []>} : vector<1x32xbf16>, vector<32x128xbf16>, vector<1x128xf32> -> vector<1x128xf32>
    %18 = arith.addf %15, %17 : vector<1x128xf32>
    %19 = math.tanh %18 : vector<1x128xf32>
    %cst_15 = arith.constant 5.000000e-01 : f32
    %20 = vector.broadcast %cst_15 : f32 to vector<1x128xf32>
    %21 = arith.mulf %20, %19 : vector<1x128xf32>
    %cst_16 = arith.constant 5.000000e-01 : f32
    %22 = vector.broadcast %cst_16 : f32 to vector<1x128xf32>
    %23 = arith.addf %21, %22 : vector<1x128xf32>
    %24 = arith.select %11, %23, %19 : vector<1x128xi1>, vector<1x128xf32>
    %25 = vector.extract_strided_slice %24 {offsets = [0, 0], sizes = [1, 32], strides = [1, 1]} : vector<1x128xf32> to vector<1x32xf32>
    %26 = vector.extract_strided_slice %24 {offsets = [0, 32], sizes = [1, 32], strides = [1, 1]} : vector<1x128xf32> to vector<1x32xf32>
    %27 = vector.extract_strided_slice %24 {offsets = [0, 64], sizes = [1, 32], strides = [1, 1]} : vector<1x128xf32> to vector<1x32xf32>
    %28 = vector.extract_strided_slice %24 {offsets = [0, 96], sizes = [1, 32], strides = [1, 1]} : vector<1x128xf32> to vector<1x32xf32>
    %29 = arith.mulf %26, %13 : vector<1x32xf32>
    %30 = arith.mulf %25, %28 : vector<1x32xf32>
    %31 = arith.addf %29, %30 : vector<1x32xf32>
    %32 = math.tanh %31 : vector<1x32xf32>
    %33 = arith.mulf %27, %32 : vector<1x32xf32>
    %34 = arith.index_cast %c0_i32 : i32 to index
    %c0_17 = arith.constant 0 : index
    %35 = vector.load %arg6[%34, %c0_17] : memref<24x32xf32, #tpu.memory_space<vmem>>, vector<1x32xf32>
    tpu.vector_store %arg6[%34, %c0_17], %33 {strides = array<i32>} : memref<24x32xf32, #tpu.memory_space<vmem>>, vector<1x32xf32>,
    %c1_i32 = arith.constant 1 : i32
    %36 = arith.index_cast %c1_i32 : i32 to index
    %c0_18 = arith.constant 0 : index
    %37 = vector.load %arg9[%36, %c0_18] : memref<24x128xf32, #tpu.memory_space<vmem>>, vector<1x128xf32>
    %38 = arith.truncf %33 : vector<1x32xf32> to vector<1x32xbf16>
    %cst_19 = arith.constant dense<0.000000e+00> : vector<1x128xf32>
    %39 = tpu.matmul %38, %0, %cst_19 {dimension_numbers = #tpu.dot_dimension_numbers<[1], [0], [0], [1], [0, 0, 1, 1], [], []>} : vector<1x32xbf16>, vector<32x128xbf16>, vector<1x128xf32> -> vector<1x128xf32>
    %40 = arith.addf %37, %39 : vector<1x128xf32>
    %41 = math.tanh %40 : vector<1x128xf32>
    %cst_20 = arith.constant 5.000000e-01 : f32
    %42 = vector.broadcast %cst_20 : f32 to vector<1x128xf32>
    %43 = arith.mulf %42, %41 : vector<1x128xf32>
    %cst_21 = arith.constant 5.000000e-01 : f32
    %44 = vector.broadcast %cst_21 : f32 to vector<1x128xf32>
    %45 = arith.addf %43, %44 : vector<1x128xf32>
    %46 = arith.select %11, %45, %41 : vector<1x128xi1>, vector<1x128xf32>
    %47 = vector.extract_strided_slice %46 {offsets = [0, 0], sizes = [1, 32], strides = [1, 1]} : vector<1x128xf32> to vector<1x32xf32>
    %48 = vector.extract_strided_slice %46 {offsets = [0, 32], sizes = [1, 32], strides = [1, 1]} : vector<1x128xf32> to vector<1x32xf32>
    %49 = vector.extract_strided_slice %46 {offsets = [0, 64], sizes = [1, 32], strides = [1, 1]} : vector<1x128xf32> to vector<1x32xf32>
    %50 = vector.extract_strided_slice %46 {offsets = [0, 96], sizes = [1, 32], strides = [1, 1]} : vector<1x128xf32> to vector<1x32xf32>
    %51 = arith.mulf %48, %31 : vector<1x32xf32>
    %52 = arith.mulf %47, %50 : vector<1x32xf32>
    %53 = arith.addf %51, %52 : vector<1x32xf32>
    %54 = math.tanh %53 : vector<1x32xf32>
    %55 = arith.mulf %49, %54 : vector<1x32xf32>
    %56 = arith.index_cast %c1_i32 : i32 to index
    %c0_22 = arith.constant 0 : index
    %57 = vector.load %arg6[%56, %c0_22] : memref<24x32xf32, #tpu.memory_space<vmem>>, vector<1x32xf32>
    tpu.vector_store %arg6[%56, %c0_22], %55 {strides = array<i32>} : memref<24x32xf32, #tpu.memory_space<vmem>>, vector<1x32xf32>,
    %c2_i32 = arith.constant 2 : i32
    %58 = arith.index_cast %c2_i32 : i32 to index
    %c0_23 = arith.constant 0 : index
    %59 = vector.load %arg9[%58, %c0_23] : memref<24x128xf32, #tpu.memory_space<vmem>>, vector<1x128xf32>
    %60 = arith.truncf %55 : vector<1x32xf32> to vector<1x32xbf16>
    %cst_24 = arith.constant dense<0.000000e+00> : vector<1x128xf32>
    %61 = tpu.matmul %60, %0, %cst_24 {dimension_numbers = #tpu.dot_dimension_numbers<[1], [0], [0], [1], [0, 0, 1, 1], [], []>} : vector<1x32xbf16>, vector<32x128xbf16>, vector<1x128xf32> -> vector<1x128xf32>
    %62 = arith.addf %59, %61 : vector<1x128xf32>
    %63 = math.tanh %62 : vector<1x128xf32>
    %cst_25 = arith.constant 5.000000e-01 : f32
    %64 = vector.broadcast %cst_25 : f32 to vector<1x128xf32>
    %65 = arith.mulf %64, %63 : vector<1x128xf32>
    %cst_26 = arith.constant 5.000000e-01 : f32
    %66 = vector.broadcast %cst_26 : f32 to vector<1x128xf32>
    %67 = arith.addf %65, %66 : vector<1x128xf32>
    %68 = arith.select %11, %67, %63 : vector<1x128xi1>, vector<1x128xf32>
    %69 = vector.extract_strided_slice %68 {offsets = [0, 0], sizes = [1, 32], strides = [1, 1]} : vector<1x128xf32> to vector<1x32xf32>
    %70 = vector.extract_strided_slice %68 {offsets = [0, 32], sizes = [1, 32], strides = [1, 1]} : vector<1x128xf32> to vector<1x32xf32>
    %71 = vector.extract_strided_slice %68 {offsets = [0, 64], sizes = [1, 32], strides = [1, 1]} : vector<1x128xf32> to vector<1x32xf32>
    %72 = vector.extract_strided_slice %68 {offsets = [0, 96], sizes = [1, 32], strides = [1, 1]} : vector<1x128xf32> to vector<1x32xf32>
    %73 = arith.mulf %70, %53 : vector<1x32xf32>
    %74 = arith.mulf %69, %72 : vector<1x32xf32>
    %75 = arith.addf %73, %74 : vector<1x32xf32>
    %76 = math.tanh %75 : vector<1x32xf32>
    %77 = arith.mulf %71, %76 : vector<1x32xf32>
    %78 = arith.index_cast %c2_i32 : i32 to index
    %c0_27 = arith.constant 0 : index
    %79 = vector.load %arg6[%78, %c0_27] : memref<24x32xf32, #tpu.memory_space<vmem>>, vector<1x32xf32>
    tpu.vector_store %arg6[%78, %c0_27], %77 {strides = array<i32>} : memref<24x32xf32, #tpu.memory_space<vmem>>, vector<1x32xf32>,
    %c3_i32 = arith.constant 3 : i32
    %80 = arith.index_cast %c3_i32 : i32 to index
    %c0_28 = arith.constant 0 : index
    %81 = vector.load %arg9[%80, %c0_28] : memref<24x128xf32, #tpu.memory_space<vmem>>, vector<1x128xf32>
    %82 = arith.truncf %77 : vector<1x32xf32> to vector<1x32xbf16>
    %cst_29 = arith.constant dense<0.000000e+00> : vector<1x128xf32>
    %83 = tpu.matmul %82, %0, %cst_29 {dimension_numbers = #tpu.dot_dimension_numbers<[1], [0], [0], [1], [0, 0, 1, 1], [], []>} : vector<1x32xbf16>, vector<32x128xbf16>, vector<1x128xf32> -> vector<1x128xf32>
    %84 = arith.addf %81, %83 : vector<1x128xf32>
    %85 = math.tanh %84 : vector<1x128xf32>
    %cst_30 = arith.constant 5.000000e-01 : f32
    %86 = vector.broadcast %cst_30 : f32 to vector<1x128xf32>
    %87 = arith.mulf %86, %85 : vector<1x128xf32>
    %cst_31 = arith.constant 5.000000e-01 : f32
    %88 = vector.broadcast %cst_31 : f32 to vector<1x128xf32>
    %89 = arith.addf %87, %88 : vector<1x128xf32>
    %90 = arith.select %11, %89, %85 : vector<1x128xi1>, vector<1x128xf32>
    %91 = vector.extract_strided_slice %90 {offsets = [0, 0], sizes = [1, 32], strides = [1, 1]} : vector<1x128xf32> to vector<1x32xf32>
    %92 = vector.extract_strided_slice %90 {offsets = [0, 32], sizes = [1, 32], strides = [1, 1]} : vector<1x128xf32> to vector<1x32xf32>
    %93 = vector.extract_strided_slice %90 {offsets = [0, 64], sizes = [1, 32], strides = [1, 1]} : vector<1x128xf32> to vector<1x32xf32>
    %94 = vector.extract_strided_slice %90 {offsets = [0, 96], sizes = [1, 32], strides = [1, 1]} : vector<1x128xf32> to vector<1x32xf32>
    %95 = arith.mulf %92, %75 : vector<1x32xf32>
    %96 = arith.mulf %91, %94 : vector<1x32xf32>
    %97 = arith.addf %95, %96 : vector<1x32xf32>
    %98 = math.tanh %97 : vector<1x32xf32>
    %99 = arith.mulf %93, %98 : vector<1x32xf32>
    %100 = arith.index_cast %c3_i32 : i32 to index
    %c0_32 = arith.constant 0 : index
    %101 = vector.load %arg6[%100, %c0_32] : memref<24x32xf32, #tpu.memory_space<vmem>>, vector<1x32xf32>
    tpu.vector_store %arg6[%100, %c0_32], %99 {strides = array<i32>} : memref<24x32xf32, #tpu.memory_space<vmem>>, vector<1x32xf32>,
    %c4_i32 = arith.constant 4 : i32
    %102 = arith.index_cast %c4_i32 : i32 to index
    %c0_33 = arith.constant 0 : index
    %103 = vector.load %arg9[%102, %c0_33] : memref<24x128xf32, #tpu.memory_space<vmem>>, vector<1x128xf32>
    %104 = arith.truncf %99 : vector<1x32xf32> to vector<1x32xbf16>
    %cst_34 = arith.constant dense<0.000000e+00> : vector<1x128xf32>
    %105 = tpu.matmul %104, %0, %cst_34 {dimension_numbers = #tpu.dot_dimension_numbers<[1], [0], [0], [1], [0, 0, 1, 1], [], []>} : vector<1x32xbf16>, vector<32x128xbf16>, vector<1x128xf32> -> vector<1x128xf32>
    %106 = arith.addf %103, %105 : vector<1x128xf32>
    %107 = math.tanh %106 : vector<1x128xf32>
    %cst_35 = arith.constant 5.000000e-01 : f32
    %108 = vector.broadcast %cst_35 : f32 to vector<1x128xf32>
    %109 = arith.mulf %108, %107 : vector<1x128xf32>
    %cst_36 = arith.constant 5.000000e-01 : f32
    %110 = vector.broadcast %cst_36 : f32 to vector<1x128xf32>
    %111 = arith.addf %109, %110 : vector<1x128xf32>
    %112 = arith.select %11, %111, %107 : vector<1x128xi1>, vector<1x128xf32>
    %113 = vector.extract_strided_slice %112 {offsets = [0, 0], sizes = [1, 32], strides = [1, 1]} : vector<1x128xf32> to vector<1x32xf32>
    %114 = vector.extract_strided_slice %112 {offsets = [0, 32], sizes = [1, 32], strides = [1, 1]} : vector<1x128xf32> to vector<1x32xf32>
    %115 = vector.extract_strided_slice %112 {offsets = [0, 64], sizes = [1, 32], strides = [1, 1]} : vector<1x128xf32> to vector<1x32xf32>
    %116 = vector.extract_strided_slice %112 {offsets = [0, 96], sizes = [1, 32], strides = [1, 1]} : vector<1x128xf32> to vector<1x32xf32>
    %117 = arith.mulf %114, %97 : vector<1x32xf32>
    %118 = arith.mulf %113, %116 : vector<1x32xf32>
    %119 = arith.addf %117, %118 : vector<1x32xf32>
    %120 = math.tanh %119 : vector<1x32xf32>
    %121 = arith.mulf %115, %120 : vector<1x32xf32>
    %122 = arith.index_cast %c4_i32 : i32 to index
    %c0_37 = arith.constant 0 : index
    %123 = vector.load %arg6[%122, %c0_37] : memref<24x32xf32, #tpu.memory_space<vmem>>, vector<1x32xf32>
    tpu.vector_store %arg6[%122, %c0_37], %121 {strides = array<i32>} : memref<24x32xf32, #tpu.memory_space<vmem>>, vector<1x32xf32>,
    %c5_i32 = arith.constant 5 : i32
    %124 = arith.index_cast %c5_i32 : i32 to index
    %c0_38 = arith.constant 0 : index
    %125 = vector.load %arg9[%124, %c0_38] : memref<24x128xf32, #tpu.memory_space<vmem>>, vector<1x128xf32>
    %126 = arith.truncf %121 : vector<1x32xf32> to vector<1x32xbf16>
    %cst_39 = arith.constant dense<0.000000e+00> : vector<1x128xf32>
    %127 = tpu.matmul %126, %0, %cst_39 {dimension_numbers = #tpu.dot_dimension_numbers<[1], [0], [0], [1], [0, 0, 1, 1], [], []>} : vector<1x32xbf16>, vector<32x128xbf16>, vector<1x128xf32> -> vector<1x128xf32>
    %128 = arith.addf %125, %127 : vector<1x128xf32>
    %129 = math.tanh %128 : vector<1x128xf32>
    %cst_40 = arith.constant 5.000000e-01 : f32
    %130 = vector.broadcast %cst_40 : f32 to vector<1x128xf32>
    %131 = arith.mulf %130, %129 : vector<1x128xf32>
    %cst_41 = arith.constant 5.000000e-01 : f32
    %132 = vector.broadcast %cst_41 : f32 to vector<1x128xf32>
    %133 = arith.addf %131, %132 : vector<1x128xf32>
    %134 = arith.select %11, %133, %129 : vector<1x128xi1>, vector<1x128xf32>
    %135 = vector.extract_strided_slice %134 {offsets = [0, 0], sizes = [1, 32], strides = [1, 1]} : vector<1x128xf32> to vector<1x32xf32>
    %136 = vector.extract_strided_slice %134 {offsets = [0, 32], sizes = [1, 32], strides = [1, 1]} : vector<1x128xf32> to vector<1x32xf32>
    %137 = vector.extract_strided_slice %134 {offsets = [0, 64], sizes = [1, 32], strides = [1, 1]} : vector<1x128xf32> to vector<1x32xf32>
    %138 = vector.extract_strided_slice %134 {offsets = [0, 96], sizes = [1, 32], strides = [1, 1]} : vector<1x128xf32> to vector<1x32xf32>
    %139 = arith.mulf %136, %119 : vector<1x32xf32>
    %140 = arith.mulf %135, %138 : vector<1x32xf32>
    %141 = arith.addf %139, %140 : vector<1x32xf32>
    %142 = math.tanh %141 : vector<1x32xf32>
    %143 = arith.mulf %137, %142 : vector<1x32xf32>
    %144 = arith.index_cast %c5_i32 : i32 to index
    %c0_42 = arith.constant 0 : index
    %145 = vector.load %arg6[%144, %c0_42] : memref<24x32xf32, #tpu.memory_space<vmem>>, vector<1x32xf32>
    tpu.vector_store %arg6[%144, %c0_42], %143 {strides = array<i32>} : memref<24x32xf32, #tpu.memory_space<vmem>>, vector<1x32xf32>,
    %c6_i32 = arith.constant 6 : i32
    %146 = arith.index_cast %c6_i32 : i32 to index
    %c0_43 = arith.constant 0 : index
    %147 = vector.load %arg9[%146, %c0_43] : memref<24x128xf32, #tpu.memory_space<vmem>>, vector<1x128xf32>
    %148 = arith.truncf %143 : vector<1x32xf32> to vector<1x32xbf16>
    %cst_44 = arith.constant dense<0.000000e+00> : vector<1x128xf32>
    %149 = tpu.matmul %148, %0, %cst_44 {dimension_numbers = #tpu.dot_dimension_numbers<[1], [0], [0], [1], [0, 0, 1, 1], [], []>} : vector<1x32xbf16>, vector<32x128xbf16>, vector<1x128xf32> -> vector<1x128xf32>
    %150 = arith.addf %147, %149 : vector<1x128xf32>
    %151 = math.tanh %150 : vector<1x128xf32>
    %cst_45 = arith.constant 5.000000e-01 : f32
    %152 = vector.broadcast %cst_45 : f32 to vector<1x128xf32>
    %153 = arith.mulf %152, %151 : vector<1x128xf32>
    %cst_46 = arith.constant 5.000000e-01 : f32
    %154 = vector.broadcast %cst_46 : f32 to vector<1x128xf32>
    %155 = arith.addf %153, %154 : vector<1x128xf32>
    %156 = arith.select %11, %155, %151 : vector<1x128xi1>, vector<1x128xf32>
    %157 = vector.extract_strided_slice %156 {offsets = [0, 0], sizes = [1, 32], strides = [1, 1]} : vector<1x128xf32> to vector<1x32xf32>
    %158 = vector.extract_strided_slice %156 {offsets = [0, 32], sizes = [1, 32], strides = [1, 1]} : vector<1x128xf32> to vector<1x32xf32>
    %159 = vector.extract_strided_slice %156 {offsets = [0, 64], sizes = [1, 32], strides = [1, 1]} : vector<1x128xf32> to vector<1x32xf32>
    %160 = vector.extract_strided_slice %156 {offsets = [0, 96], sizes = [1, 32], strides = [1, 1]} : vector<1x128xf32> to vector<1x32xf32>
    %161 = arith.mulf %158, %141 : vector<1x32xf32>
    %162 = arith.mulf %157, %160 : vector<1x32xf32>
    %163 = arith.addf %161, %162 : vector<1x32xf32>
    %164 = math.tanh %163 : vector<1x32xf32>
    %165 = arith.mulf %159, %164 : vector<1x32xf32>
    %166 = arith.index_cast %c6_i32 : i32 to index
    %c0_47 = arith.constant 0 : index
    %167 = vector.load %arg6[%166, %c0_47] : memref<24x32xf32, #tpu.memory_space<vmem>>, vector<1x32xf32>
    tpu.vector_store %arg6[%166, %c0_47], %165 {strides = array<i32>} : memref<24x32xf32, #tpu.memory_space<vmem>>, vector<1x32xf32>,
    %c7_i32 = arith.constant 7 : i32
    %168 = arith.index_cast %c7_i32 : i32 to index
    %c0_48 = arith.constant 0 : index
    %169 = vector.load %arg9[%168, %c0_48] : memref<24x128xf32, #tpu.memory_space<vmem>>, vector<1x128xf32>
    %170 = arith.truncf %165 : vector<1x32xf32> to vector<1x32xbf16>
    %cst_49 = arith.constant dense<0.000000e+00> : vector<1x128xf32>
    %171 = tpu.matmul %170, %0, %cst_49 {dimension_numbers = #tpu.dot_dimension_numbers<[1], [0], [0], [1], [0, 0, 1, 1], [], []>} : vector<1x32xbf16>, vector<32x128xbf16>, vector<1x128xf32> -> vector<1x128xf32>
    %172 = arith.addf %169, %171 : vector<1x128xf32>
    %173 = math.tanh %172 : vector<1x128xf32>
    %cst_50 = arith.constant 5.000000e-01 : f32
    %174 = vector.broadcast %cst_50 : f32 to vector<1x128xf32>
    %175 = arith.mulf %174, %173 : vector<1x128xf32>
    %cst_51 = arith.constant 5.000000e-01 : f32
    %176 = vector.broadcast %cst_51 : f32 to vector<1x128xf32>
    %177 = arith.addf %175, %176 : vector<1x128xf32>
    %178 = arith.select %11, %177, %173 : vector<1x128xi1>, vector<1x128xf32>
    %179 = vector.extract_strided_slice %178 {offsets = [0, 0], sizes = [1, 32], strides = [1, 1]} : vector<1x128xf32> to vector<1x32xf32>
    %180 = vector.extract_strided_slice %178 {offsets = [0, 32], sizes = [1, 32], strides = [1, 1]} : vector<1x128xf32> to vector<1x32xf32>
    %181 = vector.extract_strided_slice %178 {offsets = [0, 64], sizes = [1, 32], strides = [1, 1]} : vector<1x128xf32> to vector<1x32xf32>
    %182 = vector.extract_strided_slice %178 {offsets = [0, 96], sizes = [1, 32], strides = [1, 1]} : vector<1x128xf32> to vector<1x32xf32>
    %183 = arith.mulf %180, %163 : vector<1x32xf32>
    %184 = arith.mulf %179, %182 : vector<1x32xf32>
    %185 = arith.addf %183, %184 : vector<1x32xf32>
    %186 = math.tanh %185 : vector<1x32xf32>
    %187 = arith.mulf %181, %186 : vector<1x32xf32>
    %188 = arith.index_cast %c7_i32 : i32 to index
    %c0_52 = arith.constant 0 : index
    %189 = vector.load %arg6[%188, %c0_52] : memref<24x32xf32, #tpu.memory_space<vmem>>, vector<1x32xf32>
    tpu.vector_store %arg6[%188, %c0_52], %187 {strides = array<i32>} : memref<24x32xf32, #tpu.memory_space<vmem>>, vector<1x32xf32>,
    %c8_i32 = arith.constant 8 : i32
    %190 = arith.index_cast %c8_i32 : i32 to index
    %c0_53 = arith.constant 0 : index
    %191 = vector.load %arg9[%190, %c0_53] : memref<24x128xf32, #tpu.memory_space<vmem>>, vector<1x128xf32>
    %192 = arith.truncf %187 : vector<1x32xf32> to vector<1x32xbf16>
    %cst_54 = arith.constant dense<0.000000e+00> : vector<1x128xf32>
    %193 = tpu.matmul %192, %0, %cst_54 {dimension_numbers = #tpu.dot_dimension_numbers<[1], [0], [0], [1], [0, 0, 1, 1], [], []>} : vector<1x32xbf16>, vector<32x128xbf16>, vector<1x128xf32> -> vector<1x128xf32>
    %194 = arith.addf %191, %193 : vector<1x128xf32>
    %195 = math.tanh %194 : vector<1x128xf32>
    %cst_55 = arith.constant 5.000000e-01 : f32
    %196 = vector.broadcast %cst_55 : f32 to vector<1x128xf32>
    %197 = arith.mulf %196, %195 : vector<1x128xf32>
    %cst_56 = arith.constant 5.000000e-01 : f32
    %198 = vector.broadcast %cst_56 : f32 to vector<1x128xf32>
    %199 = arith.addf %197, %198 : vector<1x128xf32>
    %200 = arith.select %11, %199, %195 : vector<1x128xi1>, vector<1x128xf32>
    %201 = vector.extract_strided_slice %200 {offsets = [0, 0], sizes = [1, 32], strides = [1, 1]} : vector<1x128xf32> to vector<1x32xf32>
    %202 = vector.extract_strided_slice %200 {offsets = [0, 32], sizes = [1, 32], strides = [1, 1]} : vector<1x128xf32> to vector<1x32xf32>
    %203 = vector.extract_strided_slice %200 {offsets = [0, 64], sizes = [1, 32], strides = [1, 1]} : vector<1x128xf32> to vector<1x32xf32>
    %204 = vector.extract_strided_slice %200 {offsets = [0, 96], sizes = [1, 32], strides = [1, 1]} : vector<1x128xf32> to vector<1x32xf32>
    %205 = arith.mulf %202, %185 : vector<1x32xf32>
    %206 = arith.mulf %201, %204 : vector<1x32xf32>
    %207 = arith.addf %205, %206 : vector<1x32xf32>
    %208 = math.tanh %207 : vector<1x32xf32>
    %209 = arith.mulf %203, %208 : vector<1x32xf32>
    %210 = arith.index_cast %c8_i32 : i32 to index
    %c0_57 = arith.constant 0 : index
    %211 = vector.load %arg6[%210, %c0_57] : memref<24x32xf32, #tpu.memory_space<vmem>>, vector<1x32xf32>
    tpu.vector_store %arg6[%210, %c0_57], %209 {strides = array<i32>} : memref<24x32xf32, #tpu.memory_space<vmem>>, vector<1x32xf32>,
    %c9_i32 = arith.constant 9 : i32
    %212 = arith.index_cast %c9_i32 : i32 to index
    %c0_58 = arith.constant 0 : index
    %213 = vector.load %arg9[%212, %c0_58] : memref<24x128xf32, #tpu.memory_space<vmem>>, vector<1x128xf32>
    %214 = arith.truncf %209 : vector<1x32xf32> to vector<1x32xbf16>
    %cst_59 = arith.constant dense<0.000000e+00> : vector<1x128xf32>
    %215 = tpu.matmul %214, %0, %cst_59 {dimension_numbers = #tpu.dot_dimension_numbers<[1], [0], [0], [1], [0, 0, 1, 1], [], []>} : vector<1x32xbf16>, vector<32x128xbf16>, vector<1x128xf32> -> vector<1x128xf32>
    %216 = arith.addf %213, %215 : vector<1x128xf32>
    %217 = math.tanh %216 : vector<1x128xf32>
    %cst_60 = arith.constant 5.000000e-01 : f32
    %218 = vector.broadcast %cst_60 : f32 to vector<1x128xf32>
    %219 = arith.mulf %218, %217 : vector<1x128xf32>
    %cst_61 = arith.constant 5.000000e-01 : f32
    %220 = vector.broadcast %cst_61 : f32 to vector<1x128xf32>
    %221 = arith.addf %219, %220 : vector<1x128xf32>
    %222 = arith.select %11, %221, %217 : vector<1x128xi1>, vector<1x128xf32>
    %223 = vector.extract_strided_slice %222 {offsets = [0, 0], sizes = [1, 32], strides = [1, 1]} : vector<1x128xf32> to vector<1x32xf32>
    %224 = vector.extract_strided_slice %222 {offsets = [0, 32], sizes = [1, 32], strides = [1, 1]} : vector<1x128xf32> to vector<1x32xf32>
    %225 = vector.extract_strided_slice %222 {offsets = [0, 64], sizes = [1, 32], strides = [1, 1]} : vector<1x128xf32> to vector<1x32xf32>
    %226 = vector.extract_strided_slice %222 {offsets = [0, 96], sizes = [1, 32], strides = [1, 1]} : vector<1x128xf32> to vector<1x32xf32>
    %227 = arith.mulf %224, %207 : vector<1x32xf32>
    %228 = arith.mulf %223, %226 : vector<1x32xf32>
    %229 = arith.addf %227, %228 : vector<1x32xf32>
    %230 = math.tanh %229 : vector<1x32xf32>
    %231 = arith.mulf %225, %230 : vector<1x32xf32>
    %232 = arith.index_cast %c9_i32 : i32 to index
    %c0_62 = arith.constant 0 : index
    %233 = vector.load %arg6[%232, %c0_62] : memref<24x32xf32, #tpu.memory_space<vmem>>, vector<1x32xf32>
    tpu.vector_store %arg6[%232, %c0_62], %231 {strides = array<i32>} : memref<24x32xf32, #tpu.memory_space<vmem>>, vector<1x32xf32>,
    %c10_i32 = arith.constant 10 : i32
    %234 = arith.index_cast %c10_i32 : i32 to index
    %c0_63 = arith.constant 0 : index
    %235 = vector.load %arg9[%234, %c0_63] : memref<24x128xf32, #tpu.memory_space<vmem>>, vector<1x128xf32>
    %236 = arith.truncf %231 : vector<1x32xf32> to vector<1x32xbf16>
    %cst_64 = arith.constant dense<0.000000e+00> : vector<1x128xf32>
    %237 = tpu.matmul %236, %0, %cst_64 {dimension_numbers = #tpu.dot_dimension_numbers<[1], [0], [0], [1], [0, 0, 1, 1], [], []>} : vector<1x32xbf16>, vector<32x128xbf16>, vector<1x128xf32> -> vector<1x128xf32>
    %238 = arith.addf %235, %237 : vector<1x128xf32>
    %239 = math.tanh %238 : vector<1x128xf32>
    %cst_65 = arith.constant 5.000000e-01 : f32
    %240 = vector.broadcast %cst_65 : f32 to vector<1x128xf32>
    %241 = arith.mulf %240, %239 : vector<1x128xf32>
    %cst_66 = arith.constant 5.000000e-01 : f32
    %242 = vector.broadcast %cst_66 : f32 to vector<1x128xf32>
    %243 = arith.addf %241, %242 : vector<1x128xf32>
    %244 = arith.select %11, %243, %239 : vector<1x128xi1>, vector<1x128xf32>
    %245 = vector.extract_strided_slice %244 {offsets = [0, 0], sizes = [1, 32], strides = [1, 1]} : vector<1x128xf32> to vector<1x32xf32>
    %246 = vector.extract_strided_slice %244 {offsets = [0, 32], sizes = [1, 32], strides = [1, 1]} : vector<1x128xf32> to vector<1x32xf32>
    %247 = vector.extract_strided_slice %244 {offsets = [0, 64], sizes = [1, 32], strides = [1, 1]} : vector<1x128xf32> to vector<1x32xf32>
    %248 = vector.extract_strided_slice %244 {offsets = [0, 96], sizes = [1, 32], strides = [1, 1]} : vector<1x128xf32> to vector<1x32xf32>
    %249 = arith.mulf %246, %229 : vector<1x32xf32>
    %250 = arith.mulf %245, %248 : vector<1x32xf32>
    %251 = arith.addf %249, %250 : vector<1x32xf32>
    %252 = math.tanh %251 : vector<1x32xf32>
    %253 = arith.mulf %247, %252 : vector<1x32xf32>
    %254 = arith.index_cast %c10_i32 : i32 to index
    %c0_67 = arith.constant 0 : index
    %255 = vector.load %arg6[%254, %c0_67] : memref<24x32xf32, #tpu.memory_space<vmem>>, vector<1x32xf32>
    tpu.vector_store %arg6[%254, %c0_67], %253 {strides = array<i32>} : memref<24x32xf32, #tpu.memory_space<vmem>>, vector<1x32xf32>,
    %c11_i32 = arith.constant 11 : i32
    %256 = arith.index_cast %c11_i32 : i32 to index
    %c0_68 = arith.constant 0 : index
    %257 = vector.load %arg9[%256, %c0_68] : memref<24x128xf32, #tpu.memory_space<vmem>>, vector<1x128xf32>
    %258 = arith.truncf %253 : vector<1x32xf32> to vector<1x32xbf16>
    %cst_69 = arith.constant dense<0.000000e+00> : vector<1x128xf32>
    %259 = tpu.matmul %258, %0, %cst_69 {dimension_numbers = #tpu.dot_dimension_numbers<[1], [0], [0], [1], [0, 0, 1, 1], [], []>} : vector<1x32xbf16>, vector<32x128xbf16>, vector<1x128xf32> -> vector<1x128xf32>
    %260 = arith.addf %257, %259 : vector<1x128xf32>
    %261 = math.tanh %260 : vector<1x128xf32>
    %cst_70 = arith.constant 5.000000e-01 : f32
    %262 = vector.broadcast %cst_70 : f32 to vector<1x128xf32>
    %263 = arith.mulf %262, %261 : vector<1x128xf32>
    %cst_71 = arith.constant 5.000000e-01 : f32
    %264 = vector.broadcast %cst_71 : f32 to vector<1x128xf32>
    %265 = arith.addf %263, %264 : vector<1x128xf32>
    %266 = arith.select %11, %265, %261 : vector<1x128xi1>, vector<1x128xf32>
    %267 = vector.extract_strided_slice %266 {offsets = [0, 0], sizes = [1, 32], strides = [1, 1]} : vector<1x128xf32> to vector<1x32xf32>
    %268 = vector.extract_strided_slice %266 {offsets = [0, 32], sizes = [1, 32], strides = [1, 1]} : vector<1x128xf32> to vector<1x32xf32>
    %269 = vector.extract_strided_slice %266 {offsets = [0, 64], sizes = [1, 32], strides = [1, 1]} : vector<1x128xf32> to vector<1x32xf32>
    %270 = vector.extract_strided_slice %266 {offsets = [0, 96], sizes = [1, 32], strides = [1, 1]} : vector<1x128xf32> to vector<1x32xf32>
    %271 = arith.mulf %268, %251 : vector<1x32xf32>
    %272 = arith.mulf %267, %270 : vector<1x32xf32>
    %273 = arith.addf %271, %272 : vector<1x32xf32>
    %274 = math.tanh %273 : vector<1x32xf32>
    %275 = arith.mulf %269, %274 : vector<1x32xf32>
    %276 = arith.index_cast %c11_i32 : i32 to index
    %c0_72 = arith.constant 0 : index
    %277 = vector.load %arg6[%276, %c0_72] : memref<24x32xf32, #tpu.memory_space<vmem>>, vector<1x32xf32>
    tpu.vector_store %arg6[%276, %c0_72], %275 {strides = array<i32>} : memref<24x32xf32, #tpu.memory_space<vmem>>, vector<1x32xf32>,
    %c12_i32 = arith.constant 12 : i32
    %278 = arith.index_cast %c12_i32 : i32 to index
    %c0_73 = arith.constant 0 : index
    %279 = vector.load %arg9[%278, %c0_73] : memref<24x128xf32, #tpu.memory_space<vmem>>, vector<1x128xf32>
    %280 = arith.truncf %275 : vector<1x32xf32> to vector<1x32xbf16>
    %cst_74 = arith.constant dense<0.000000e+00> : vector<1x128xf32>
    %281 = tpu.matmul %280, %0, %cst_74 {dimension_numbers = #tpu.dot_dimension_numbers<[1], [0], [0], [1], [0, 0, 1, 1], [], []>} : vector<1x32xbf16>, vector<32x128xbf16>, vector<1x128xf32> -> vector<1x128xf32>
    %282 = arith.addf %279, %281 : vector<1x128xf32>
    %283 = math.tanh %282 : vector<1x128xf32>
    %cst_75 = arith.constant 5.000000e-01 : f32
    %284 = vector.broadcast %cst_75 : f32 to vector<1x128xf32>
    %285 = arith.mulf %284, %283 : vector<1x128xf32>
    %cst_76 = arith.constant 5.000000e-01 : f32
    %286 = vector.broadcast %cst_76 : f32 to vector<1x128xf32>
    %287 = arith.addf %285, %286 : vector<1x128xf32>
    %288 = arith.select %11, %287, %283 : vector<1x128xi1>, vector<1x128xf32>
    %289 = vector.extract_strided_slice %288 {offsets = [0, 0], sizes = [1, 32], strides = [1, 1]} : vector<1x128xf32> to vector<1x32xf32>
    %290 = vector.extract_strided_slice %288 {offsets = [0, 32], sizes = [1, 32], strides = [1, 1]} : vector<1x128xf32> to vector<1x32xf32>
    %291 = vector.extract_strided_slice %288 {offsets = [0, 64], sizes = [1, 32], strides = [1, 1]} : vector<1x128xf32> to vector<1x32xf32>
    %292 = vector.extract_strided_slice %288 {offsets = [0, 96], sizes = [1, 32], strides = [1, 1]} : vector<1x128xf32> to vector<1x32xf32>
    %293 = arith.mulf %290, %273 : vector<1x32xf32>
    %294 = arith.mulf %289, %292 : vector<1x32xf32>
    %295 = arith.addf %293, %294 : vector<1x32xf32>
    %296 = math.tanh %295 : vector<1x32xf32>
    %297 = arith.mulf %291, %296 : vector<1x32xf32>
    %298 = arith.index_cast %c12_i32 : i32 to index
    %c0_77 = arith.constant 0 : index
    %299 = vector.load %arg6[%298, %c0_77] : memref<24x32xf32, #tpu.memory_space<vmem>>, vector<1x32xf32>
    tpu.vector_store %arg6[%298, %c0_77], %297 {strides = array<i32>} : memref<24x32xf32, #tpu.memory_space<vmem>>, vector<1x32xf32>,
    %c13_i32 = arith.constant 13 : i32
    %300 = arith.index_cast %c13_i32 : i32 to index
    %c0_78 = arith.constant 0 : index
    %301 = vector.load %arg9[%300, %c0_78] : memref<24x128xf32, #tpu.memory_space<vmem>>, vector<1x128xf32>
    %302 = arith.truncf %297 : vector<1x32xf32> to vector<1x32xbf16>
    %cst_79 = arith.constant dense<0.000000e+00> : vector<1x128xf32>
    %303 = tpu.matmul %302, %0, %cst_79 {dimension_numbers = #tpu.dot_dimension_numbers<[1], [0], [0], [1], [0, 0, 1, 1], [], []>} : vector<1x32xbf16>, vector<32x128xbf16>, vector<1x128xf32> -> vector<1x128xf32>
    %304 = arith.addf %301, %303 : vector<1x128xf32>
    %305 = math.tanh %304 : vector<1x128xf32>
    %cst_80 = arith.constant 5.000000e-01 : f32
    %306 = vector.broadcast %cst_80 : f32 to vector<1x128xf32>
    %307 = arith.mulf %306, %305 : vector<1x128xf32>
    %cst_81 = arith.constant 5.000000e-01 : f32
    %308 = vector.broadcast %cst_81 : f32 to vector<1x128xf32>
    %309 = arith.addf %307, %308 : vector<1x128xf32>
    %310 = arith.select %11, %309, %305 : vector<1x128xi1>, vector<1x128xf32>
    %311 = vector.extract_strided_slice %310 {offsets = [0, 0], sizes = [1, 32], strides = [1, 1]} : vector<1x128xf32> to vector<1x32xf32>
    %312 = vector.extract_strided_slice %310 {offsets = [0, 32], sizes = [1, 32], strides = [1, 1]} : vector<1x128xf32> to vector<1x32xf32>
    %313 = vector.extract_strided_slice %310 {offsets = [0, 64], sizes = [1, 32], strides = [1, 1]} : vector<1x128xf32> to vector<1x32xf32>
    %314 = vector.extract_strided_slice %310 {offsets = [0, 96], sizes = [1, 32], strides = [1, 1]} : vector<1x128xf32> to vector<1x32xf32>
    %315 = arith.mulf %312, %295 : vector<1x32xf32>
    %316 = arith.mulf %311, %314 : vector<1x32xf32>
    %317 = arith.addf %315, %316 : vector<1x32xf32>
    %318 = math.tanh %317 : vector<1x32xf32>
    %319 = arith.mulf %313, %318 : vector<1x32xf32>
    %320 = arith.index_cast %c13_i32 : i32 to index
    %c0_82 = arith.constant 0 : index
    %321 = vector.load %arg6[%320, %c0_82] : memref<24x32xf32, #tpu.memory_space<vmem>>, vector<1x32xf32>
    tpu.vector_store %arg6[%320, %c0_82], %319 {strides = array<i32>} : memref<24x32xf32, #tpu.memory_space<vmem>>, vector<1x32xf32>,
    %c14_i32 = arith.constant 14 : i32
    %322 = arith.index_cast %c14_i32 : i32 to index
    %c0_83 = arith.constant 0 : index
    %323 = vector.load %arg9[%322, %c0_83] : memref<24x128xf32, #tpu.memory_space<vmem>>, vector<1x128xf32>
    %324 = arith.truncf %319 : vector<1x32xf32> to vector<1x32xbf16>
    %cst_84 = arith.constant dense<0.000000e+00> : vector<1x128xf32>
    %325 = tpu.matmul %324, %0, %cst_84 {dimension_numbers = #tpu.dot_dimension_numbers<[1], [0], [0], [1], [0, 0, 1, 1], [], []>} : vector<1x32xbf16>, vector<32x128xbf16>, vector<1x128xf32> -> vector<1x128xf32>
    %326 = arith.addf %323, %325 : vector<1x128xf32>
    %327 = math.tanh %326 : vector<1x128xf32>
    %cst_85 = arith.constant 5.000000e-01 : f32
    %328 = vector.broadcast %cst_85 : f32 to vector<1x128xf32>
    %329 = arith.mulf %328, %327 : vector<1x128xf32>
    %cst_86 = arith.constant 5.000000e-01 : f32
    %330 = vector.broadcast %cst_86 : f32 to vector<1x128xf32>
    %331 = arith.addf %329, %330 : vector<1x128xf32>
    %332 = arith.select %11, %331, %327 : vector<1x128xi1>, vector<1x128xf32>
    %333 = vector.extract_strided_slice %332 {offsets = [0, 0], sizes = [1, 32], strides = [1, 1]} : vector<1x128xf32> to vector<1x32xf32>
    %334 = vector.extract_strided_slice %332 {offsets = [0, 32], sizes = [1, 32], strides = [1, 1]} : vector<1x128xf32> to vector<1x32xf32>
    %335 = vector.extract_strided_slice %332 {offsets = [0, 64], sizes = [1, 32], strides = [1, 1]} : vector<1x128xf32> to vector<1x32xf32>
    %336 = vector.extract_strided_slice %332 {offsets = [0, 96], sizes = [1, 32], strides = [1, 1]} : vector<1x128xf32> to vector<1x32xf32>
    %337 = arith.mulf %334, %317 : vector<1x32xf32>
    %338 = arith.mulf %333, %336 : vector<1x32xf32>
    %339 = arith.addf %337, %338 : vector<1x32xf32>
    %340 = math.tanh %339 : vector<1x32xf32>
    %341 = arith.mulf %335, %340 : vector<1x32xf32>
    %342 = arith.index_cast %c14_i32 : i32 to index
    %c0_87 = arith.constant 0 : index
    %343 = vector.load %arg6[%342, %c0_87] : memref<24x32xf32, #tpu.memory_space<vmem>>, vector<1x32xf32>
    tpu.vector_store %arg6[%342, %c0_87], %341 {strides = array<i32>} : memref<24x32xf32, #tpu.memory_space<vmem>>, vector<1x32xf32>,
    %c15_i32 = arith.constant 15 : i32
    %344 = arith.index_cast %c15_i32 : i32 to index
    %c0_88 = arith.constant 0 : index
    %345 = vector.load %arg9[%344, %c0_88] : memref<24x128xf32, #tpu.memory_space<vmem>>, vector<1x128xf32>
    %346 = arith.truncf %341 : vector<1x32xf32> to vector<1x32xbf16>
    %cst_89 = arith.constant dense<0.000000e+00> : vector<1x128xf32>
    %347 = tpu.matmul %346, %0, %cst_89 {dimension_numbers = #tpu.dot_dimension_numbers<[1], [0], [0], [1], [0, 0, 1, 1], [], []>} : vector<1x32xbf16>, vector<32x128xbf16>, vector<1x128xf32> -> vector<1x128xf32>
    %348 = arith.addf %345, %347 : vector<1x128xf32>
    %349 = math.tanh %348 : vector<1x128xf32>
    %cst_90 = arith.constant 5.000000e-01 : f32
    %350 = vector.broadcast %cst_90 : f32 to vector<1x128xf32>
    %351 = arith.mulf %350, %349 : vector<1x128xf32>
    %cst_91 = arith.constant 5.000000e-01 : f32
    %352 = vector.broadcast %cst_91 : f32 to vector<1x128xf32>
    %353 = arith.addf %351, %352 : vector<1x128xf32>
    %354 = arith.select %11, %353, %349 : vector<1x128xi1>, vector<1x128xf32>
    %355 = vector.extract_strided_slice %354 {offsets = [0, 0], sizes = [1, 32], strides = [1, 1]} : vector<1x128xf32> to vector<1x32xf32>
    %356 = vector.extract_strided_slice %354 {offsets = [0, 32], sizes = [1, 32], strides = [1, 1]} : vector<1x128xf32> to vector<1x32xf32>
    %357 = vector.extract_strided_slice %354 {offsets = [0, 64], sizes = [1, 32], strides = [1, 1]} : vector<1x128xf32> to vector<1x32xf32>
    %358 = vector.extract_strided_slice %354 {offsets = [0, 96], sizes = [1, 32], strides = [1, 1]} : vector<1x128xf32> to vector<1x32xf32>
    %359 = arith.mulf %356, %339 : vector<1x32xf32>
    %360 = arith.mulf %355, %358 : vector<1x32xf32>
    %361 = arith.addf %359, %360 : vector<1x32xf32>
    %362 = math.tanh %361 : vector<1x32xf32>
    %363 = arith.mulf %357, %362 : vector<1x32xf32>
    %364 = arith.index_cast %c15_i32 : i32 to index
    %c0_92 = arith.constant 0 : index
    %365 = vector.load %arg6[%364, %c0_92] : memref<24x32xf32, #tpu.memory_space<vmem>>, vector<1x32xf32>
    tpu.vector_store %arg6[%364, %c0_92], %363 {strides = array<i32>} : memref<24x32xf32, #tpu.memory_space<vmem>>, vector<1x32xf32>,
    %c16_i32 = arith.constant 16 : i32
    %366 = arith.index_cast %c16_i32 : i32 to index
    %c0_93 = arith.constant 0 : index
    %367 = vector.load %arg9[%366, %c0_93] : memref<24x128xf32, #tpu.memory_space<vmem>>, vector<1x128xf32>
    %368 = arith.truncf %363 : vector<1x32xf32> to vector<1x32xbf16>
    %cst_94 = arith.constant dense<0.000000e+00> : vector<1x128xf32>
    %369 = tpu.matmul %368, %0, %cst_94 {dimension_numbers = #tpu.dot_dimension_numbers<[1], [0], [0], [1], [0, 0, 1, 1], [], []>} : vector<1x32xbf16>, vector<32x128xbf16>, vector<1x128xf32> -> vector<1x128xf32>
    %370 = arith.addf %367, %369 : vector<1x128xf32>
    %371 = math.tanh %370 : vector<1x128xf32>
    %cst_95 = arith.constant 5.000000e-01 : f32
    %372 = vector.broadcast %cst_95 : f32 to vector<1x128xf32>
    %373 = arith.mulf %372, %371 : vector<1x128xf32>
    %cst_96 = arith.constant 5.000000e-01 : f32
    %374 = vector.broadcast %cst_96 : f32 to vector<1x128xf32>
    %375 = arith.addf %373, %374 : vector<1x128xf32>
    %376 = arith.select %11, %375, %371 : vector<1x128xi1>, vector<1x128xf32>
    %377 = vector.extract_strided_slice %376 {offsets = [0, 0], sizes = [1, 32], strides = [1, 1]} : vector<1x128xf32> to vector<1x32xf32>
    %378 = vector.extract_strided_slice %376 {offsets = [0, 32], sizes = [1, 32], strides = [1, 1]} : vector<1x128xf32> to vector<1x32xf32>
    %379 = vector.extract_strided_slice %376 {offsets = [0, 64], sizes = [1, 32], strides = [1, 1]} : vector<1x128xf32> to vector<1x32xf32>
    %380 = vector.extract_strided_slice %376 {offsets = [0, 96], sizes = [1, 32], strides = [1, 1]} : vector<1x128xf32> to vector<1x32xf32>
    %381 = arith.mulf %378, %361 : vector<1x32xf32>
    %382 = arith.mulf %377, %380 : vector<1x32xf32>
    %383 = arith.addf %381, %382 : vector<1x32xf32>
    %384 = math.tanh %383 : vector<1x32xf32>
    %385 = arith.mulf %379, %384 : vector<1x32xf32>
    %386 = arith.index_cast %c16_i32 : i32 to index
    %c0_97 = arith.constant 0 : index
    %387 = vector.load %arg6[%386, %c0_97] : memref<24x32xf32, #tpu.memory_space<vmem>>, vector<1x32xf32>
    tpu.vector_store %arg6[%386, %c0_97], %385 {strides = array<i32>} : memref<24x32xf32, #tpu.memory_space<vmem>>, vector<1x32xf32>,
    %c17_i32 = arith.constant 17 : i32
    %388 = arith.index_cast %c17_i32 : i32 to index
    %c0_98 = arith.constant 0 : index
    %389 = vector.load %arg9[%388, %c0_98] : memref<24x128xf32, #tpu.memory_space<vmem>>, vector<1x128xf32>
    %390 = arith.truncf %385 : vector<1x32xf32> to vector<1x32xbf16>
    %cst_99 = arith.constant dense<0.000000e+00> : vector<1x128xf32>
    %391 = tpu.matmul %390, %0, %cst_99 {dimension_numbers = #tpu.dot_dimension_numbers<[1], [0], [0], [1], [0, 0, 1, 1], [], []>} : vector<1x32xbf16>, vector<32x128xbf16>, vector<1x128xf32> -> vector<1x128xf32>
    %392 = arith.addf %389, %391 : vector<1x128xf32>
    %393 = math.tanh %392 : vector<1x128xf32>
    %cst_100 = arith.constant 5.000000e-01 : f32
    %394 = vector.broadcast %cst_100 : f32 to vector<1x128xf32>
    %395 = arith.mulf %394, %393 : vector<1x128xf32>
    %cst_101 = arith.constant 5.000000e-01 : f32
    %396 = vector.broadcast %cst_101 : f32 to vector<1x128xf32>
    %397 = arith.addf %395, %396 : vector<1x128xf32>
    %398 = arith.select %11, %397, %393 : vector<1x128xi1>, vector<1x128xf32>
    %399 = vector.extract_strided_slice %398 {offsets = [0, 0], sizes = [1, 32], strides = [1, 1]} : vector<1x128xf32> to vector<1x32xf32>
    %400 = vector.extract_strided_slice %398 {offsets = [0, 32], sizes = [1, 32], strides = [1, 1]} : vector<1x128xf32> to vector<1x32xf32>
    %401 = vector.extract_strided_slice %398 {offsets = [0, 64], sizes = [1, 32], strides = [1, 1]} : vector<1x128xf32> to vector<1x32xf32>
    %402 = vector.extract_strided_slice %398 {offsets = [0, 96], sizes = [1, 32], strides = [1, 1]} : vector<1x128xf32> to vector<1x32xf32>
    %403 = arith.mulf %400, %383 : vector<1x32xf32>
    %404 = arith.mulf %399, %402 : vector<1x32xf32>
    %405 = arith.addf %403, %404 : vector<1x32xf32>
    %406 = math.tanh %405 : vector<1x32xf32>
    %407 = arith.mulf %401, %406 : vector<1x32xf32>
    %408 = arith.index_cast %c17_i32 : i32 to index
    %c0_102 = arith.constant 0 : index
    %409 = vector.load %arg6[%408, %c0_102] : memref<24x32xf32, #tpu.memory_space<vmem>>, vector<1x32xf32>
    tpu.vector_store %arg6[%408, %c0_102], %407 {strides = array<i32>} : memref<24x32xf32, #tpu.memory_space<vmem>>, vector<1x32xf32>,
    %c18_i32 = arith.constant 18 : i32
    %410 = arith.index_cast %c18_i32 : i32 to index
    %c0_103 = arith.constant 0 : index
    %411 = vector.load %arg9[%410, %c0_103] : memref<24x128xf32, #tpu.memory_space<vmem>>, vector<1x128xf32>
    %412 = arith.truncf %407 : vector<1x32xf32> to vector<1x32xbf16>
    %cst_104 = arith.constant dense<0.000000e+00> : vector<1x128xf32>
    %413 = tpu.matmul %412, %0, %cst_104 {dimension_numbers = #tpu.dot_dimension_numbers<[1], [0], [0], [1], [0, 0, 1, 1], [], []>} : vector<1x32xbf16>, vector<32x128xbf16>, vector<1x128xf32> -> vector<1x128xf32>
    %414 = arith.addf %411, %413 : vector<1x128xf32>
    %415 = math.tanh %414 : vector<1x128xf32>
    %cst_105 = arith.constant 5.000000e-01 : f32
    %416 = vector.broadcast %cst_105 : f32 to vector<1x128xf32>
    %417 = arith.mulf %416, %415 : vector<1x128xf32>
    %cst_106 = arith.constant 5.000000e-01 : f32
    %418 = vector.broadcast %cst_106 : f32 to vector<1x128xf32>
    %419 = arith.addf %417, %418 : vector<1x128xf32>
    %420 = arith.select %11, %419, %415 : vector<1x128xi1>, vector<1x128xf32>
    %421 = vector.extract_strided_slice %420 {offsets = [0, 0], sizes = [1, 32], strides = [1, 1]} : vector<1x128xf32> to vector<1x32xf32>
    %422 = vector.extract_strided_slice %420 {offsets = [0, 32], sizes = [1, 32], strides = [1, 1]} : vector<1x128xf32> to vector<1x32xf32>
    %423 = vector.extract_strided_slice %420 {offsets = [0, 64], sizes = [1, 32], strides = [1, 1]} : vector<1x128xf32> to vector<1x32xf32>
    %424 = vector.extract_strided_slice %420 {offsets = [0, 96], sizes = [1, 32], strides = [1, 1]} : vector<1x128xf32> to vector<1x32xf32>
    %425 = arith.mulf %422, %405 : vector<1x32xf32>
    %426 = arith.mulf %421, %424 : vector<1x32xf32>
    %427 = arith.addf %425, %426 : vector<1x32xf32>
    %428 = math.tanh %427 : vector<1x32xf32>
    %429 = arith.mulf %423, %428 : vector<1x32xf32>
    %430 = arith.index_cast %c18_i32 : i32 to index
    %c0_107 = arith.constant 0 : index
    %431 = vector.load %arg6[%430, %c0_107] : memref<24x32xf32, #tpu.memory_space<vmem>>, vector<1x32xf32>
    tpu.vector_store %arg6[%430, %c0_107], %429 {strides = array<i32>} : memref<24x32xf32, #tpu.memory_space<vmem>>, vector<1x32xf32>,
    %c19_i32 = arith.constant 19 : i32
    %432 = arith.index_cast %c19_i32 : i32 to index
    %c0_108 = arith.constant 0 : index
    %433 = vector.load %arg9[%432, %c0_108] : memref<24x128xf32, #tpu.memory_space<vmem>>, vector<1x128xf32>
    %434 = arith.truncf %429 : vector<1x32xf32> to vector<1x32xbf16>
    %cst_109 = arith.constant dense<0.000000e+00> : vector<1x128xf32>
    %435 = tpu.matmul %434, %0, %cst_109 {dimension_numbers = #tpu.dot_dimension_numbers<[1], [0], [0], [1], [0, 0, 1, 1], [], []>} : vector<1x32xbf16>, vector<32x128xbf16>, vector<1x128xf32> -> vector<1x128xf32>
    %436 = arith.addf %433, %435 : vector<1x128xf32>
    %437 = math.tanh %436 : vector<1x128xf32>
    %cst_110 = arith.constant 5.000000e-01 : f32
    %438 = vector.broadcast %cst_110 : f32 to vector<1x128xf32>
    %439 = arith.mulf %438, %437 : vector<1x128xf32>
    %cst_111 = arith.constant 5.000000e-01 : f32
    %440 = vector.broadcast %cst_111 : f32 to vector<1x128xf32>
    %441 = arith.addf %439, %440 : vector<1x128xf32>
    %442 = arith.select %11, %441, %437 : vector<1x128xi1>, vector<1x128xf32>
    %443 = vector.extract_strided_slice %442 {offsets = [0, 0], sizes = [1, 32], strides = [1, 1]} : vector<1x128xf32> to vector<1x32xf32>
    %444 = vector.extract_strided_slice %442 {offsets = [0, 32], sizes = [1, 32], strides = [1, 1]} : vector<1x128xf32> to vector<1x32xf32>
    %445 = vector.extract_strided_slice %442 {offsets = [0, 64], sizes = [1, 32], strides = [1, 1]} : vector<1x128xf32> to vector<1x32xf32>
    %446 = vector.extract_strided_slice %442 {offsets = [0, 96], sizes = [1, 32], strides = [1, 1]} : vector<1x128xf32> to vector<1x32xf32>
    %447 = arith.mulf %444, %427 : vector<1x32xf32>
    %448 = arith.mulf %443, %446 : vector<1x32xf32>
    %449 = arith.addf %447, %448 : vector<1x32xf32>
    %450 = math.tanh %449 : vector<1x32xf32>
    %451 = arith.mulf %445, %450 : vector<1x32xf32>
    %452 = arith.index_cast %c19_i32 : i32 to index
    %c0_112 = arith.constant 0 : index
    %453 = vector.load %arg6[%452, %c0_112] : memref<24x32xf32, #tpu.memory_space<vmem>>, vector<1x32xf32>
    tpu.vector_store %arg6[%452, %c0_112], %451 {strides = array<i32>} : memref<24x32xf32, #tpu.memory_space<vmem>>, vector<1x32xf32>,
    %c20_i32 = arith.constant 20 : i32
    %454 = arith.index_cast %c20_i32 : i32 to index
    %c0_113 = arith.constant 0 : index
    %455 = vector.load %arg9[%454, %c0_113] : memref<24x128xf32, #tpu.memory_space<vmem>>, vector<1x128xf32>
    %456 = arith.truncf %451 : vector<1x32xf32> to vector<1x32xbf16>
    %cst_114 = arith.constant dense<0.000000e+00> : vector<1x128xf32>
    %457 = tpu.matmul %456, %0, %cst_114 {dimension_numbers = #tpu.dot_dimension_numbers<[1], [0], [0], [1], [0, 0, 1, 1], [], []>} : vector<1x32xbf16>, vector<32x128xbf16>, vector<1x128xf32> -> vector<1x128xf32>
    %458 = arith.addf %455, %457 : vector<1x128xf32>
    %459 = math.tanh %458 : vector<1x128xf32>
    %cst_115 = arith.constant 5.000000e-01 : f32
    %460 = vector.broadcast %cst_115 : f32 to vector<1x128xf32>
    %461 = arith.mulf %460, %459 : vector<1x128xf32>
    %cst_116 = arith.constant 5.000000e-01 : f32
    %462 = vector.broadcast %cst_116 : f32 to vector<1x128xf32>
    %463 = arith.addf %461, %462 : vector<1x128xf32>
    %464 = arith.select %11, %463, %459 : vector<1x128xi1>, vector<1x128xf32>
    %465 = vector.extract_strided_slice %464 {offsets = [0, 0], sizes = [1, 32], strides = [1, 1]} : vector<1x128xf32> to vector<1x32xf32>
    %466 = vector.extract_strided_slice %464 {offsets = [0, 32], sizes = [1, 32], strides = [1, 1]} : vector<1x128xf32> to vector<1x32xf32>
    %467 = vector.extract_strided_slice %464 {offsets = [0, 64], sizes = [1, 32], strides = [1, 1]} : vector<1x128xf32> to vector<1x32xf32>
    %468 = vector.extract_strided_slice %464 {offsets = [0, 96], sizes = [1, 32], strides = [1, 1]} : vector<1x128xf32> to vector<1x32xf32>
    %469 = arith.mulf %466, %449 : vector<1x32xf32>
    %470 = arith.mulf %465, %468 : vector<1x32xf32>
    %471 = arith.addf %469, %470 : vector<1x32xf32>
    %472 = math.tanh %471 : vector<1x32xf32>
    %473 = arith.mulf %467, %472 : vector<1x32xf32>
    %474 = arith.index_cast %c20_i32 : i32 to index
    %c0_117 = arith.constant 0 : index
    %475 = vector.load %arg6[%474, %c0_117] : memref<24x32xf32, #tpu.memory_space<vmem>>, vector<1x32xf32>
    tpu.vector_store %arg6[%474, %c0_117], %473 {strides = array<i32>} : memref<24x32xf32, #tpu.memory_space<vmem>>, vector<1x32xf32>,
    %c21_i32 = arith.constant 21 : i32
    %476 = arith.index_cast %c21_i32 : i32 to index
    %c0_118 = arith.constant 0 : index
    %477 = vector.load %arg9[%476, %c0_118] : memref<24x128xf32, #tpu.memory_space<vmem>>, vector<1x128xf32>
    %478 = arith.truncf %473 : vector<1x32xf32> to vector<1x32xbf16>
    %cst_119 = arith.constant dense<0.000000e+00> : vector<1x128xf32>
    %479 = tpu.matmul %478, %0, %cst_119 {dimension_numbers = #tpu.dot_dimension_numbers<[1], [0], [0], [1], [0, 0, 1, 1], [], []>} : vector<1x32xbf16>, vector<32x128xbf16>, vector<1x128xf32> -> vector<1x128xf32>
    %480 = arith.addf %477, %479 : vector<1x128xf32>
    %481 = math.tanh %480 : vector<1x128xf32>
    %cst_120 = arith.constant 5.000000e-01 : f32
    %482 = vector.broadcast %cst_120 : f32 to vector<1x128xf32>
    %483 = arith.mulf %482, %481 : vector<1x128xf32>
    %cst_121 = arith.constant 5.000000e-01 : f32
    %484 = vector.broadcast %cst_121 : f32 to vector<1x128xf32>
    %485 = arith.addf %483, %484 : vector<1x128xf32>
    %486 = arith.select %11, %485, %481 : vector<1x128xi1>, vector<1x128xf32>
    %487 = vector.extract_strided_slice %486 {offsets = [0, 0], sizes = [1, 32], strides = [1, 1]} : vector<1x128xf32> to vector<1x32xf32>
    %488 = vector.extract_strided_slice %486 {offsets = [0, 32], sizes = [1, 32], strides = [1, 1]} : vector<1x128xf32> to vector<1x32xf32>
    %489 = vector.extract_strided_slice %486 {offsets = [0, 64], sizes = [1, 32], strides = [1, 1]} : vector<1x128xf32> to vector<1x32xf32>
    %490 = vector.extract_strided_slice %486 {offsets = [0, 96], sizes = [1, 32], strides = [1, 1]} : vector<1x128xf32> to vector<1x32xf32>
    %491 = arith.mulf %488, %471 : vector<1x32xf32>
    %492 = arith.mulf %487, %490 : vector<1x32xf32>
    %493 = arith.addf %491, %492 : vector<1x32xf32>
    %494 = math.tanh %493 : vector<1x32xf32>
    %495 = arith.mulf %489, %494 : vector<1x32xf32>
    %496 = arith.index_cast %c21_i32 : i32 to index
    %c0_122 = arith.constant 0 : index
    %497 = vector.load %arg6[%496, %c0_122] : memref<24x32xf32, #tpu.memory_space<vmem>>, vector<1x32xf32>
    tpu.vector_store %arg6[%496, %c0_122], %495 {strides = array<i32>} : memref<24x32xf32, #tpu.memory_space<vmem>>, vector<1x32xf32>,
    %c22_i32 = arith.constant 22 : i32
    %498 = arith.index_cast %c22_i32 : i32 to index
    %c0_123 = arith.constant 0 : index
    %499 = vector.load %arg9[%498, %c0_123] : memref<24x128xf32, #tpu.memory_space<vmem>>, vector<1x128xf32>
    %500 = arith.truncf %495 : vector<1x32xf32> to vector<1x32xbf16>
    %cst_124 = arith.constant dense<0.000000e+00> : vector<1x128xf32>
    %501 = tpu.matmul %500, %0, %cst_124 {dimension_numbers = #tpu.dot_dimension_numbers<[1], [0], [0], [1], [0, 0, 1, 1], [], []>} : vector<1x32xbf16>, vector<32x128xbf16>, vector<1x128xf32> -> vector<1x128xf32>
    %502 = arith.addf %499, %501 : vector<1x128xf32>
    %503 = math.tanh %502 : vector<1x128xf32>
    %cst_125 = arith.constant 5.000000e-01 : f32
    %504 = vector.broadcast %cst_125 : f32 to vector<1x128xf32>
    %505 = arith.mulf %504, %503 : vector<1x128xf32>
    %cst_126 = arith.constant 5.000000e-01 : f32
    %506 = vector.broadcast %cst_126 : f32 to vector<1x128xf32>
    %507 = arith.addf %505, %506 : vector<1x128xf32>
    %508 = arith.select %11, %507, %503 : vector<1x128xi1>, vector<1x128xf32>
    %509 = vector.extract_strided_slice %508 {offsets = [0, 0], sizes = [1, 32], strides = [1, 1]} : vector<1x128xf32> to vector<1x32xf32>
    %510 = vector.extract_strided_slice %508 {offsets = [0, 32], sizes = [1, 32], strides = [1, 1]} : vector<1x128xf32> to vector<1x32xf32>
    %511 = vector.extract_strided_slice %508 {offsets = [0, 64], sizes = [1, 32], strides = [1, 1]} : vector<1x128xf32> to vector<1x32xf32>
    %512 = vector.extract_strided_slice %508 {offsets = [0, 96], sizes = [1, 32], strides = [1, 1]} : vector<1x128xf32> to vector<1x32xf32>
    %513 = arith.mulf %510, %493 : vector<1x32xf32>
    %514 = arith.mulf %509, %512 : vector<1x32xf32>
    %515 = arith.addf %513, %514 : vector<1x32xf32>
    %516 = math.tanh %515 : vector<1x32xf32>
    %517 = arith.mulf %511, %516 : vector<1x32xf32>
    %518 = arith.index_cast %c22_i32 : i32 to index
    %c0_127 = arith.constant 0 : index
    %519 = vector.load %arg6[%518, %c0_127] : memref<24x32xf32, #tpu.memory_space<vmem>>, vector<1x32xf32>
    tpu.vector_store %arg6[%518, %c0_127], %517 {strides = array<i32>} : memref<24x32xf32, #tpu.memory_space<vmem>>, vector<1x32xf32>,
    %c23_i32 = arith.constant 23 : i32
    %520 = arith.index_cast %c23_i32 : i32 to index
    %c0_128 = arith.constant 0 : index
    %521 = vector.load %arg9[%520, %c0_128] : memref<24x128xf32, #tpu.memory_space<vmem>>, vector<1x128xf32>
    %522 = arith.truncf %517 : vector<1x32xf32> to vector<1x32xbf16>
    %cst_129 = arith.constant dense<0.000000e+00> : vector<1x128xf32>
    %523 = tpu.matmul %522, %0, %cst_129 {dimension_numbers = #tpu.dot_dimension_numbers<[1], [0], [0], [1], [0, 0, 1, 1], [], []>} : vector<1x32xbf16>, vector<32x128xbf16>, vector<1x128xf32> -> vector<1x128xf32>
    %524 = arith.addf %521, %523 : vector<1x128xf32>
    %525 = math.tanh %524 : vector<1x128xf32>
    %cst_130 = arith.constant 5.000000e-01 : f32
    %526 = vector.broadcast %cst_130 : f32 to vector<1x128xf32>
    %527 = arith.mulf %526, %525 : vector<1x128xf32>
    %cst_131 = arith.constant 5.000000e-01 : f32
    %528 = vector.broadcast %cst_131 : f32 to vector<1x128xf32>
    %529 = arith.addf %527, %528 : vector<1x128xf32>
    %530 = arith.select %11, %529, %525 : vector<1x128xi1>, vector<1x128xf32>
    %531 = vector.extract_strided_slice %530 {offsets = [0, 0], sizes = [1, 32], strides = [1, 1]} : vector<1x128xf32> to vector<1x32xf32>
    %532 = vector.extract_strided_slice %530 {offsets = [0, 32], sizes = [1, 32], strides = [1, 1]} : vector<1x128xf32> to vector<1x32xf32>
    %533 = vector.extract_strided_slice %530 {offsets = [0, 64], sizes = [1, 32], strides = [1, 1]} : vector<1x128xf32> to vector<1x32xf32>
    %534 = vector.extract_strided_slice %530 {offsets = [0, 96], sizes = [1, 32], strides = [1, 1]} : vector<1x128xf32> to vector<1x32xf32>
    %535 = arith.mulf %532, %515 : vector<1x32xf32>
    %536 = arith.mulf %531, %534 : vector<1x32xf32>
    %537 = arith.addf %535, %536 : vector<1x32xf32>
    %538 = math.tanh %537 : vector<1x32xf32>
    %539 = arith.mulf %533, %538 : vector<1x32xf32>
    %540 = arith.index_cast %c23_i32 : i32 to index
    %c0_132 = arith.constant 0 : index
    %541 = vector.load %arg6[%540, %c0_132] : memref<24x32xf32, #tpu.memory_space<vmem>>, vector<1x32xf32>
    tpu.vector_store %arg6[%540, %c0_132], %539 {strides = array<i32>} : memref<24x32xf32, #tpu.memory_space<vmem>>, vector<1x32xf32>,
    %c24_i32 = arith.constant 24 : i32
    %c0_133 = arith.constant 0 : index
    %c0_134 = arith.constant 0 : index
    %542 = vector.load %arg7[%c0_133, %c0_134] : memref<1x32xf32, #tpu.memory_space<vmem>>, vector<1x32xf32>
    tpu.vector_store %arg7[%c0_133, %c0_134], %539 {strides = array<i32>} : memref<1x32xf32, #tpu.memory_space<vmem>>, vector<1x32xf32>,
    %c0_135 = arith.constant 0 : index
    %c0_136 = arith.constant 0 : index
    %543 = vector.load %arg8[%c0_135, %c0_136] : memref<1x32xf32, #tpu.memory_space<vmem>>, vector<1x32xf32>
    tpu.vector_store %arg8[%c0_135, %c0_136], %537 {strides = array<i32>} : memref<1x32xf32, #tpu.memory_space<vmem>>, vector<1x32xf32>,
    return
  }
}

</mosaic_0001>

<bundles_post_ra>
// kernel: encoder_rnn_forward.1
= control target key start
LH: loop header
LB: loop body
LE: loop exit
PB: predicated region body
PF: predicated region fallthrough
CT: control target
= control target key end

     0   :  { %14 = vsyncpa [#allocation4], 0  ;;  %vm53_vm0 = vcmask 130048   ;;  %v2469_v6 = vmov 0.0   ;;  %vm2470_vm1 = vmmov 0   ;;  %s3093_s0 = inlined_call_operand.vmem [shape: f32[24,16], index: 0, kind: input, shape index: {}]   ;;  %s3094_s1 = inlined_call_operand.vmem [shape: f32[1,32], index: 1, kind: input, shape index: {}]   ;;  %s3095_s2 = inlined_call_operand.vmem [shape: f32[1,32], index: 2, kind: input, shape index: {}]   ;;  %s3096_s3 = inlined_call_operand.vmem [shape: bf16[16,128], index: 3, kind: input, shape index: {}]   ;;  %s3097_s4 = inlined_call_operand.vmem [shape: bf16[32,128], index: 4, kind: input, shape index: {}]   ;;  %s3098_s5 = inlined_call_operand.vmem [shape: f32[1,128], index: 5, kind: input, shape index: {}]   ;;  %s3099_s6 = inlined_call_operand.hbm [shape: f32[24,32], index: 6, kind: output, shape index: {0}]   ;;  %s3100_s7 = inlined_call_operand.hbm [shape: f32[1,32], index: 7, kind: output, shape index: {1}]   ;;  %s3101_s8 = inlined_call_operand.hbm [shape: f32[1,32], index: 8, kind: output, shape index: {2}]  }
   0x1   :  { %v2298_v0 = vld [vmem:[%s3096_s3] sm:$0xff]   ;;  %v34_v2 = vld [vmem:[%s3093_s0 + $0x8] sm:$0xff]  ;;  %v35_v3 = vld [vmem:[%s3093_s0 + $0x10] sm:$0xff]  ;;  %2096 = vmatprep.subr.bf16.mxu1 %v2469_v6  ;;  %2100 = vmatprep.mubr.msk.bf16.mxu1 %vm2470_vm1, %v2469_v6 }
   0x2   :  { %v33_v1 = vld [vmem:[%s3093_s0] sm:$0xff]  ;;  %2090 = vmatprep.subr.bf16.mxu0 %v2298_v0  ;;  %v37_v5 = vpack.c.bf16 %v35_v3, %v35_v3  ;;  %v2549_v8 = vld [vmem:[%s3097_s4 + $0x8] sm:$0xff]  }
   0x3   :  { %v36_v4 = vpack.c.bf16 %v34_v2, %v33_v1  ;;  %v2540_v7 = vld [vmem:[%s3097_s4] sm:$0xff]   ;;  %2091 = vmatpush3.bf16.msra.mxu0 %v2298_v0 }
   0x4   :  { %2097 = vmatpush3.bf16.msra.mxu1 %v2540_v7  ;;  %v114_v9 = vld [vmem:[%s3094_s1] sm:$0x1] }
   0x5   :  { %2092 = vmatprep.mubr.msk.bf16.mxu0 %vm53_vm0, %v36_v4 }
   0x6   :  { %15 = vsyncpa [#allocation6], 0  ;;  %2098 = vmatprep.subr.bf16.mxu1 %v2469_v6  ;;  %2104 = vmatprep.subr.bf16.mxu0 %v2469_v6  ;;  %v117_v10 = vpack.c.bf16 %v114_v9, %v114_v9  ;;  %vm130_vm2 = vcmask 261120   ;;  %v1984_v11 = vld [vmem:[%s3098_s5] ss:$0 sm:$0xff]  ;;  %v111_v25 = vlaneseq  ;;  %s2471_s5 = smov 32  }
   0x7   :  { %2093 = vmatmul.mubr.msk.bf16.vlgmr.msra.gmra.mrb[0].mxu0 %vm53_vm0, %v37_v5  ;;  %v1991_v31 = vld [vmem:[%s3095_s2] ss:$0 sm:$0xff]  ;;  %s2472_s2 = smov 64   ;;  %vm208_vm4 = vcmask 253952   ;;  %s2474_s24 = smov [#allocation5]  }
   0x8   :  { %2105 = vmatpush3.bf16.msra.mxu0 %v2540_v7  ;;  %2108 = vmatprep.mubr.msk.bf16.mxu0 %vm2470_vm1, %v2469_v6  ;;  %v2575_v26 = vand.u32 127, %v111_v25  ;;  %s1959_s25 = sshll.u32 %s2474_s24, 4  ;;  %s2475_s26 = smov [#allocation3]   ;;  %s1960_s25 = int_to_ptr.vmem [resolvable:$true] %s1959_s25 }
   0x9   :  { %2099 = vmatpush3.bf16.msra.mxu1 %v2549_v8  ;;  %2106 = vmatprep.subr.bf16.mxu0 %v2469_v6  ;;  %s1946_s27 = sshll.u32 %s2475_s26, 4  ;;  %s2476_s28 = smov [#allocation7]   ;;  %s3039_s27 = int_to_ptr.vmem [resolvable:$true] %s1946_s27 }
   0xa   :  { %2112 = vmatprep.subr.bf16.mxu1 %v2469_v6  ;;  %vm113_vm3 = vcmp.lt.s32.totalorder %v2575_v26, 96  ;;  %s1969_s29 = sshll.u32 %s2476_s28, 4  ;;  %s2399_s30 = scalar_lea.vmem %s1960_s25, 16  ;;  %s3043_s29 = int_to_ptr.vmem [resolvable:$true] %s1969_s29 }
   0xb   :  { %p2400_p0 = scmp.ne.s32.totalorder %s1960_s25, %s2399_s30  ;;  %s2403_s9 = scalar_lea.vmem %s1960_s25, 32 }
   0xc   :  { %2101 = vmatmul.mubr.msk.bf16.vlgmr.msra.gmra.mrb[0].mxu1 %vm130_vm2, %v117_v10  ;;  %2107 = vmatpush3.bf16.msra.mxu0 %v2549_v8  ;;  %p2404_p1 = scmp.lt.s32.totalorder %s1960_s25, %s1960_s25  ;;  %p2405_p2 = scmp.lt.s32.totalorder %s2403_s9, %s2399_s30 }
   0xd   :  { %2113 = vmatpush3.bf16.msra.mxu1 %v2540_v7  ;;  %2116 = vmatprep.mubr.msk.bf16.mxu1 %vm2470_vm1, %v2469_v6 }
   0xe   :  { %2114 = vmatprep.subr.bf16.mxu1 %v2469_v6  ;;  %2120 = vmatprep.subr.bf16.mxu0 %v2469_v6  ;;  %p2406_p3 = por %p2405_p2, %p2404_p1 }
  0x10   :  { %p2407_p4 = pnand %p2406_p3, %p2400_p0 }
  0x11   :  { %2115 = vmatpush3.bf16.msra.mxu1 %v2549_v8 }
  0x12   :  { %2128 = vmatprep.subr.bf16.mxu1 %v2469_v6 }
  0xda   :  { %v2094_v12 = vpop.f32.mrb[0].mxu0 }
  0xdb   :  { %v103_v13 = vadd.f32 %v2094_v12, %v1984_v11  ;;  %v94_v14 = vpop.f32.mrb[1].mxu0 }
  0xdc   :  { %v95_v15 = vadd.f32 %v1984_v11, %v94_v14  ;;  %v2095_v16 = vpop.f32.mrb[2].mxu0 }
  0xdd   :  { %110 = vst [vmem:[#allocation2 + $0x10] sm:$0xff] %v103_v13  ;;  %v97_v17 = vpop.f32.mrb[3].mxu0 }
  0xde   :  { %108 = vst [vmem:[#allocation2] sm:$0xff] %v95_v15  ;;  %v98_v18 = vadd.f32 %v1984_v11, %v97_v17 }
  0xdf   :  { %v168_v19 = vpop.f32.mrb[0].mxu1 }
  0xe0   :  { %109 = vst [vmem:[#allocation2 + $0x8] sm:$0xff] %v98_v18  ;;  %v2102_v20 = vpop.f32.mrb[1].mxu1 }
  0xe1   :  { %v171_v21 = vpop.f32.mrb[2].mxu1 }
  0xe2   :  { %v2103_v22 = vpop.f32.mrb[3].mxu1 }
  0xe5   :  { %v116_v23 = vld [vmem:[#allocation2] sm:$0x1]  ;;  %v210_v43 = vld [vmem:[#allocation2 + $0x1] sm:$0x1]  ;;  %v285_v63 = vld [vmem:[#allocation2 + $0x2] sm:$0x1] }
  0xe6   :  { %v174_v24 = vadd.f32 %v168_v19, %v116_v23  ;;  %v360_v22 = vld [vmem:[#allocation2 + $0x3] sm:$0x1] }
  0xe8   :  { %2301 = vtanh.f32 %v174_v24 }
  0xf2   :  { %v2302_v27 = vpop.eup %2301 }
  0xf3   :  { %v176_v28 = vmul.f32 0.5, %v2302_v27 }
  0xf5   :  { %v177_v29 = vadd.f32 0.5, %v176_v28 }
  0xf7   :  { %v178_v30 = vsel %vm113_vm3, %v177_v29, %v2302_v27 }
  0xf8   :  { %189 = vrot.lane.b32.xlu0 %v178_v30, %s2471_s5 }
  0xfc   :  { %184 = vrot.lane.b32.xlu0 %v1991_v31, %s2471_s5 }
 0x16a   :  { %v190_v32 = vpop.permute.xlu0 %189 }
 0x16b   :  { %v192_v33 = vmul.f32 %v190_v32, %v178_v30 }
 0x16d   :  { %194 = vrot.lane.b32.xlu1 %v192_v33, %s2471_s5 }
 0x16e   :  { %v185_v34 = vpop.permute.xlu0 %184 }
 0x16f   :  { %v187_v35 = vmul.f32 %v185_v34, %v178_v30 }
 0x1df   :  { %v195_v36 = vpop.permute.xlu1 %194 }
 0x1e0   :  { %v197_v37 = vadd.f32 %v195_v36, %v187_v35 }
 0x1e2   :  { %2303 = vtanh.f32 %v197_v37 }
 0x1ec   :  { %v2304_v38 = vpop.eup %2303 }
 0x1ed   :  { %200 = vrot.lane.b32.xlu1 %v2304_v38, %s2471_s5 }
 0x25f   :  { %v201_v39 = vpop.permute.xlu1 %200 }
 0x260   :  { %v2587_v40 = vmul.f32 %v201_v39, %v178_v30 }
 0x262   :  { %v211_v41 = vpack.c.bf16 %v2587_v40, %v2587_v40 }
 0x264   :  { %213 = vrot.lane.b32.xlu0 %v211_v41, %s2472_s2 }
 0x2d6   :  { %v214_v42 = vpop.permute.xlu0 %213 }
 0x2d7   :  { %2109 = vmatmul.mubr.msk.bf16.vlgmr.msra.gmra.mrb[4].mxu0 %vm130_vm2, %v214_v42 }
 0x2d8   :  { %2121 = vmatpush3.bf16.msra.mxu0 %v2540_v7  ;;  %2124 = vmatprep.mubr.msk.bf16.mxu0 %vm2470_vm1, %v2469_v6 }
 0x2d9   :  { %2122 = vmatprep.subr.bf16.mxu0 %v2469_v6 }
 0x2dc   :  { %2123 = vmatpush3.bf16.msra.mxu0 %v2549_v8 }
 0x2dd   :  { %2136 = vmatprep.subr.bf16.mxu0 %v2469_v6 }
 0x3aa   :  { %v252_v44 = vpop.f32.mrb[4].mxu0 }
 0x3ab   :  { %v258_v45 = vadd.f32 %v252_v44, %v210_v43  ;;  %v2110_v46 = vpop.f32.mrb[5].mxu0  ;;  %v435_v44 = vld [vmem:[#allocation2 + $0x4] sm:$0x1] }
 0x3ac   :  { %v255_v47 = vpop.f32.mrb[6].mxu0 }
 0x3ad   :  { %2305 = vtanh.f32 %v258_v45  ;;  %v2111_v48 = vpop.f32.mrb[7].mxu0 }
 0x3b7   :  { %v2306_v49 = vpop.eup %2305 }
 0x3b8   :  { %v260_v50 = vmul.f32 0.5, %v2306_v49 }
 0x3ba   :  { %v261_v51 = vadd.f32 0.5, %v260_v50 }
 0x3bc   :  { %v262_v52 = vsel %vm113_vm3, %v261_v51, %v2306_v49 }
 0x3bd   :  { %265 = vrot.lane.b32.xlu1 %v262_v52, %s2471_s5  ;;  %v263_v55 = vmul.f32 %v262_v52, %v197_v37 }
 0x42f   :  { %v266_v53 = vpop.permute.xlu1 %265 }
 0x430   :  { %v268_v54 = vmul.f32 %v266_v53, %v262_v52 }
 0x432   :  { %270 = vrot.lane.b32.xlu0 %v268_v54, %s2471_s5 }
 0x4a4   :  { %v271_v56 = vpop.permute.xlu0 %270 }
 0x4a5   :  { %v273_v57 = vadd.f32 %v271_v56, %v263_v55 }
 0x4a7   :  { %2307 = vtanh.f32 %v273_v57 }
 0x4b1   :  { %v2308_v58 = vpop.eup %2307 }
 0x4b2   :  { %276 = vrot.lane.b32.xlu1 %v2308_v58, %s2471_s5 }
 0x524   :  { %v277_v59 = vpop.permute.xlu1 %276 }
 0x525   :  { %v2604_v60 = vmul.f32 %v277_v59, %v262_v52 }
 0x527   :  { %v286_v61 = vpack.c.bf16 %v2604_v60, %v2604_v60 }
 0x529   :  { %288 = vrot.lane.b32.xlu0 %v286_v61, %s2472_s2 }
 0x59b   :  { %v289_v62 = vpop.permute.xlu0 %288 }
 0x59c   :  { %2117 = vmatmul.mubr.msk.bf16.vlgmr.msra.gmra.mrb[4].mxu1 %vm130_vm2, %v289_v62 }
 0x59d   :  { %2129 = vmatpush3.bf16.msra.mxu1 %v2540_v7  ;;  %2132 = vmatprep.mubr.msk.bf16.mxu1 %vm2470_vm1, %v2469_v6 }
 0x59e   :  { %2130 = vmatprep.subr.bf16.mxu1 %v2469_v6 }
 0x5a1   :  { %2131 = vmatpush3.bf16.msra.mxu1 %v2549_v8 }
 0x5a2   :  { %2144 = vmatprep.subr.bf16.mxu1 %v2469_v6 }
 0x66f   :  { %v327_v0 = vpop.f32.mrb[4].mxu1 }
 0x670   :  { %v333_v1 = vadd.f32 %v327_v0, %v285_v63  ;;  %v2118_v2 = vpop.f32.mrb[5].mxu1 }
 0x671   :  { %v330_v3 = vpop.f32.mrb[6].mxu1 }
 0x672   :  { %2309 = vtanh.f32 %v333_v1  ;;  %v2119_v4 = vpop.f32.mrb[7].mxu1  ;;  %v510_v1 = vld [vmem:[#allocation2 + $0x5] sm:$0x1] }
 0x67c   :  { %v2310_v5 = vpop.eup %2309 }
 0x67d   :  { %v335_v9 = vmul.f32 0.5, %v2310_v5 }
 0x67f   :  { %v336_v10 = vadd.f32 0.5, %v335_v9 }
 0x681   :  { %v337_v11 = vsel %vm113_vm3, %v336_v10, %v2310_v5 }
 0x682   :  { %340 = vrot.lane.b32.xlu1 %v337_v11, %s2471_s5  ;;  %v338_v14 = vmul.f32 %v337_v11, %v273_v57 }
 0x6f4   :  { %v341_v12 = vpop.permute.xlu1 %340 }
 0x6f5   :  { %v343_v13 = vmul.f32 %v341_v12, %v337_v11 }
 0x6f7   :  { %345 = vrot.lane.b32.xlu0 %v343_v13, %s2471_s5 }
 0x769   :  { %v346_v15 = vpop.permute.xlu0 %345 }
 0x76a   :  { %v348_v16 = vadd.f32 %v346_v15, %v338_v14 }
 0x76c   :  { %2311 = vtanh.f32 %v348_v16 }
 0x776   :  { %v2312_v17 = vpop.eup %2311 }
 0x777   :  { %351 = vrot.lane.b32.xlu1 %v2312_v17, %s2471_s5 }
 0x7e9   :  { %v352_v18 = vpop.permute.xlu1 %351 }
 0x7ea   :  { %v2621_v19 = vmul.f32 %v352_v18, %v337_v11 }
 0x7ec   :  { %v361_v20 = vpack.c.bf16 %v2621_v19, %v2621_v19 }
 0x7ee   :  { %363 = vrot.lane.b32.xlu0 %v361_v20, %s2472_s2 }
 0x860   :  { %v364_v21 = vpop.permute.xlu0 %363 }
 0x861   :  { %2125 = vmatmul.mubr.msk.bf16.vlgmr.msra.gmra.mrb[8].mxu0 %vm130_vm2, %v364_v21 }
 0x862   :  { %2137 = vmatpush3.bf16.msra.mxu0 %v2540_v7  ;;  %2140 = vmatprep.mubr.msk.bf16.mxu0 %vm2470_vm1, %v2469_v6 }
 0x863   :  { %2138 = vmatprep.subr.bf16.mxu0 %v2469_v6 }
 0x866   :  { %2139 = vmatpush3.bf16.msra.mxu0 %v2549_v8 }
 0x867   :  { %2152 = vmatprep.subr.bf16.mxu0 %v2469_v6 }
 0x934   :  { %v402_v23 = vpop.f32.mrb[8].mxu0 }
 0x935   :  { %v408_v24 = vadd.f32 %v402_v23, %v360_v22  ;;  %v2126_v25 = vpop.f32.mrb[9].mxu0 }
 0x936   :  { %v405_v27 = vpop.f32.mrb[10].mxu0  ;;  %v585_v25 = vld [vmem:[#allocation2 + $0x6] sm:$0x1] }
 0x937   :  { %2313 = vtanh.f32 %v408_v24  ;;  %v2127_v28 = vpop.f32.mrb[11].mxu0 }
 0x941   :  { %v2314_v29 = vpop.eup %2313 }
 0x942   :  { %v410_v30 = vmul.f32 0.5, %v2314_v29 }
 0x944   :  { %v411_v31 = vadd.f32 0.5, %v410_v30 }
 0x946   :  { %v412_v32 = vsel %vm113_vm3, %v411_v31, %v2314_v29 }
 0x947   :  { %415 = vrot.lane.b32.xlu1 %v412_v32, %s2471_s5  ;;  %v413_v35 = vmul.f32 %v412_v32, %v348_v16 }
 0x9b9   :  { %v416_v33 = vpop.permute.xlu1 %415 }
 0x9ba   :  { %v418_v34 = vmul.f32 %v416_v33, %v412_v32 }
 0x9bc   :  { %420 = vrot.lane.b32.xlu0 %v418_v34, %s2471_s5 }
 0xa2e   :  { %v421_v36 = vpop.permute.xlu0 %420 }
 0xa2f   :  { %v423_v37 = vadd.f32 %v421_v36, %v413_v35 }
 0xa31   :  { %2315 = vtanh.f32 %v423_v37 }
 0xa3b   :  { %v2316_v38 = vpop.eup %2315 }
 0xa3c   :  { %426 = vrot.lane.b32.xlu1 %v2316_v38, %s2471_s5 }
 0xaae   :  { %v427_v39 = vpop.permute.xlu1 %426 }
 0xaaf   :  { %v2638_v41 = vmul.f32 %v427_v39, %v412_v32 }
 0xab1   :  { %v436_v42 = vpack.c.bf16 %v2638_v41, %v2638_v41 }
 0xab3   :  { %438 = vrot.lane.b32.xlu0 %v436_v42, %s2472_s2 }
 0xb25   :  { %v439_v43 = vpop.permute.xlu0 %438 }
 0xb26   :  { %2133 = vmatmul.mubr.msk.bf16.vlgmr.msra.gmra.mrb[8].mxu1 %vm130_vm2, %v439_v43 }
 0xb27   :  { %2145 = vmatpush3.bf16.msra.mxu1 %v2540_v7  ;;  %2148 = vmatprep.mubr.msk.bf16.mxu1 %vm2470_vm1, %v2469_v6 }
 0xb28   :  { %2146 = vmatprep.subr.bf16.mxu1 %v2469_v6 }
 0xb2b   :  { %2147 = vmatpush3.bf16.msra.mxu1 %v2549_v8 }
 0xb2c   :  { %2160 = vmatprep.subr.bf16.mxu1 %v2469_v6 }
 0xbf9   :  { %v477_v45 = vpop.f32.mrb[8].mxu1 }
 0xbfa   :  { %v483_v46 = vadd.f32 %v477_v45, %v435_v44  ;;  %v2134_v47 = vpop.f32.mrb[9].mxu1 }
 0xbfb   :  { %v480_v48 = vpop.f32.mrb[10].mxu1 }
 0xbfc   :  { %2317 = vtanh.f32 %v483_v46  ;;  %v2135_v49 = vpop.f32.mrb[11].mxu1  ;;  %v660_v48 = vld [vmem:[#allocation2 + $0x7] sm:$0x1] }
 0xc06   :  { %v2318_v50 = vpop.eup %2317 }
 0xc07   :  { %v485_v51 = vmul.f32 0.5, %v2318_v50 }
 0xc09   :  { %v486_v52 = vadd.f32 0.5, %v485_v51 }
 0xc0b   :  { %v487_v53 = vsel %vm113_vm3, %v486_v52, %v2318_v50 }
 0xc0c   :  { %490 = vrot.lane.b32.xlu1 %v487_v53, %s2471_s5  ;;  %v488_v56 = vmul.f32 %v487_v53, %v423_v37 }
 0xc7e   :  { %v491_v54 = vpop.permute.xlu1 %490 }
 0xc7f   :  { %v493_v55 = vmul.f32 %v491_v54, %v487_v53 }
 0xc81   :  { %495 = vrot.lane.b32.xlu0 %v493_v55, %s2471_s5 }
 0xcf3   :  { %v496_v57 = vpop.permute.xlu0 %495 }
 0xcf4   :  { %v498_v58 = vadd.f32 %v496_v57, %v488_v56 }
 0xcf6   :  { %2319 = vtanh.f32 %v498_v58 }
 0xd00   :  { %v2320_v59 = vpop.eup %2319 }
 0xd01   :  { %501 = vrot.lane.b32.xlu1 %v2320_v59, %s2471_s5 }
 0xd73   :  { %v502_v61 = vpop.permute.xlu1 %501 }
 0xd74   :  { %v2655_v62 = vmul.f32 %v502_v61, %v487_v53 }
 0xd76   :  { %v511_v63 = vpack.c.bf16 %v2655_v62, %v2655_v62 }
 0xd78   :  { %513 = vrot.lane.b32.xlu0 %v511_v63, %s2472_s2 }
 0xdea   :  { %v514_v0 = vpop.permute.xlu0 %513 }
 0xdeb   :  { %2141 = vmatmul.mubr.msk.bf16.vlgmr.msra.gmra.mrb[12].mxu0 %vm130_vm2, %v514_v0 }
 0xdec   :  { %2153 = vmatpush3.bf16.msra.mxu0 %v2540_v7  ;;  %2156 = vmatprep.mubr.msk.bf16.mxu0 %vm2470_vm1, %v2469_v6 }
 0xded   :  { %2154 = vmatprep.subr.bf16.mxu0 %v2469_v6 }
 0xdf0   :  { %2155 = vmatpush3.bf16.msra.mxu0 %v2549_v8 }
 0xdf1   :  { %2168 = vmatprep.subr.bf16.mxu0 %v2469_v6 }
 0xebe   :  { %v552_v2 = vpop.f32.mrb[12].mxu0 }
 0xebf   :  { %v558_v3 = vadd.f32 %v552_v2, %v510_v1  ;;  %v2142_v4 = vpop.f32.mrb[13].mxu0 }
 0xec0   :  { %v555_v5 = vpop.f32.mrb[14].mxu0 }
 0xec1   :  { %2321 = vtanh.f32 %v558_v3  ;;  %v2143_v9 = vpop.f32.mrb[15].mxu0 }
 0xec2   :  { %v735_v9 = vld [vmem:[#allocation2 + $0x8] sm:$0x1] }
 0xecb   :  { %v2322_v10 = vpop.eup %2321 }
 0xecc   :  { %v560_v11 = vmul.f32 0.5, %v2322_v10 }
 0xece   :  { %v561_v12 = vadd.f32 0.5, %v560_v11 }
 0xed0   :  { %v562_v13 = vsel %vm113_vm3, %v561_v12, %v2322_v10 }
 0xed1   :  { %565 = vrot.lane.b32.xlu1 %v562_v13, %s2471_s5  ;;  %v563_v16 = vmul.f32 %v562_v13, %v498_v58 }
 0xf43   :  { %v566_v14 = vpop.permute.xlu1 %565 }
 0xf44   :  { %v568_v15 = vmul.f32 %v566_v14, %v562_v13 }
 0xf46   :  { %570 = vrot.lane.b32.xlu0 %v568_v15, %s2471_s5 }
 0xfb8   :  { %v571_v17 = vpop.permute.xlu0 %570 }
 0xfb9   :  { %v573_v18 = vadd.f32 %v571_v17, %v563_v16 }
 0xfbb   :  { %2323 = vtanh.f32 %v573_v18 }
 0xfc5   :  { %v2324_v20 = vpop.eup %2323 }
 0xfc6   :  { %576 = vrot.lane.b32.xlu1 %v2324_v20, %s2471_s5 }
0x1038   :  { %v577_v21 = vpop.permute.xlu1 %576 }
0x1039   :  { %v2672_v22 = vmul.f32 %v577_v21, %v562_v13 }
0x103b   :  { %v586_v23 = vpack.c.bf16 %v2672_v22, %v2672_v22 }
0x103d   :  { %588 = vrot.lane.b32.xlu0 %v586_v23, %s2472_s2 }
0x10af   :  { %v589_v24 = vpop.permute.xlu0 %588 }
0x10b0   :  { %2149 = vmatmul.mubr.msk.bf16.vlgmr.msra.gmra.mrb[12].mxu1 %vm130_vm2, %v589_v24 }
0x10b1   :  { %2161 = vmatpush3.bf16.msra.mxu1 %v2540_v7  ;;  %2164 = vmatprep.mubr.msk.bf16.mxu1 %vm2470_vm1, %v2469_v6 }
0x10b2   :  { %2162 = vmatprep.subr.bf16.mxu1 %v2469_v6 }
0x10b5   :  { %2163 = vmatpush3.bf16.msra.mxu1 %v2549_v8 }
0x10b6   :  { %2176 = vmatprep.subr.bf16.mxu1 %v2469_v6 }
0x1183   :  { %v627_v27 = vpop.f32.mrb[12].mxu1 }
0x1184   :  { %v633_v28 = vadd.f32 %v627_v27, %v585_v25  ;;  %v2150_v29 = vpop.f32.mrb[13].mxu1 }
0x1185   :  { %v630_v30 = vpop.f32.mrb[14].mxu1 }
0x1186   :  { %2325 = vtanh.f32 %v633_v28  ;;  %v2151_v31 = vpop.f32.mrb[15].mxu1 }
0x1190   :  { %v2326_v32 = vpop.eup %2325 }
0x1191   :  { %v635_v33 = vmul.f32 0.5, %v2326_v32 }
0x1193   :  { %v636_v34 = vadd.f32 0.5, %v635_v33 }
0x1195   :  { %v637_v35 = vsel %vm113_vm3, %v636_v34, %v2326_v32  ;;  %v810_v32 = vld [vmem:[#allocation2 + $0x9] sm:$0x1] }
0x1196   :  { %640 = vrot.lane.b32.xlu1 %v637_v35, %s2471_s5  ;;  %v638_v38 = vmul.f32 %v637_v35, %v573_v18 }
0x1208   :  { %v641_v36 = vpop.permute.xlu1 %640 }
0x1209   :  { %v643_v37 = vmul.f32 %v641_v36, %v637_v35 }
0x120b   :  { %645 = vrot.lane.b32.xlu0 %v643_v37, %s2471_s5 }
0x127d   :  { %v646_v39 = vpop.permute.xlu0 %645 }
0x127e   :  { %v648_v42 = vadd.f32 %v646_v39, %v638_v38 }
0x1280   :  { %2327 = vtanh.f32 %v648_v42 }
0x128a   :  { %v2328_v43 = vpop.eup %2327 }
0x128b   :  { %651 = vrot.lane.b32.xlu1 %v2328_v43, %s2471_s5 }
0x12fd   :  { %v652_v44 = vpop.permute.xlu1 %651 }
0x12fe   :  { %v2689_v45 = vmul.f32 %v652_v44, %v637_v35 }
0x1300   :  { %v661_v46 = vpack.c.bf16 %v2689_v45, %v2689_v45 }
0x1302   :  { %663 = vrot.lane.b32.xlu0 %v661_v46, %s2472_s2 }
0x1374   :  { %v664_v47 = vpop.permute.xlu0 %663 }
0x1375   :  { %2157 = vmatmul.mubr.msk.bf16.vlgmr.msra.gmra.mrb[16].mxu0 %vm130_vm2, %v664_v47 }
0x1376   :  { %2169 = vmatpush3.bf16.msra.mxu0 %v2540_v7  ;;  %2172 = vmatprep.mubr.msk.bf16.mxu0 %vm2470_vm1, %v2469_v6 }
0x1377   :  { %2170 = vmatprep.subr.bf16.mxu0 %v2469_v6 }
0x137a   :  { %2171 = vmatpush3.bf16.msra.mxu0 %v2549_v8 }
0x137b   :  { %2184 = vmatprep.subr.bf16.mxu0 %v2469_v6 }
0x1448   :  { %v702_v49 = vpop.f32.mrb[16].mxu0 }
0x1449   :  { %v708_v50 = vadd.f32 %v702_v49, %v660_v48  ;;  %v2158_v51 = vpop.f32.mrb[17].mxu0 }
0x144a   :  { %v705_v52 = vpop.f32.mrb[18].mxu0 }
0x144b   :  { %2329 = vtanh.f32 %v708_v50  ;;  %v2159_v53 = vpop.f32.mrb[19].mxu0 }
0x1455   :  { %v2330_v54 = vpop.eup %2329 }
0x1456   :  { %v710_v55 = vmul.f32 0.5, %v2330_v54 }
0x1458   :  { %v711_v56 = vadd.f32 0.5, %v710_v55  ;;  %v885_v55 = vld [vmem:[#allocation2 + $0xa] sm:$0x1] }
0x145a   :  { %v712_v57 = vsel %vm113_vm3, %v711_v56, %v2330_v54 }
0x145b   :  { %715 = vrot.lane.b32.xlu1 %v712_v57, %s2471_s5  ;;  %v713_v61 = vmul.f32 %v712_v57, %v648_v42 }
0x14cd   :  { %v716_v58 = vpop.permute.xlu1 %715 }
0x14ce   :  { %v718_v59 = vmul.f32 %v716_v58, %v712_v57 }
0x14d0   :  { %720 = vrot.lane.b32.xlu0 %v718_v59, %s2471_s5 }
0x1542   :  { %v721_v63 = vpop.permute.xlu0 %720 }
0x1543   :  { %v723_v0 = vadd.f32 %v721_v63, %v713_v61 }
0x1545   :  { %2331 = vtanh.f32 %v723_v0 }
0x154f   :  { %v2332_v1 = vpop.eup %2331 }
0x1550   :  { %726 = vrot.lane.b32.xlu1 %v2332_v1, %s2471_s5 }
0x15c2   :  { %v727_v2 = vpop.permute.xlu1 %726 }
0x15c3   :  { %v2706_v3 = vmul.f32 %v727_v2, %v712_v57 }
0x15c5   :  { %v736_v4 = vpack.c.bf16 %v2706_v3, %v2706_v3 }
0x15c7   :  { %738 = vrot.lane.b32.xlu0 %v736_v4, %s2472_s2 }
0x1639   :  { %v739_v5 = vpop.permute.xlu0 %738 }
0x163a   :  { %2165 = vmatmul.mubr.msk.bf16.vlgmr.msra.gmra.mrb[16].mxu1 %vm130_vm2, %v739_v5 }
0x163b   :  { %2177 = vmatpush3.bf16.msra.mxu1 %v2540_v7  ;;  %2180 = vmatprep.mubr.msk.bf16.mxu1 %vm2470_vm1, %v2469_v6 }
0x163c   :  { %2178 = vmatprep.subr.bf16.mxu1 %v2469_v6 }
0x163f   :  { %2179 = vmatpush3.bf16.msra.mxu1 %v2549_v8 }
0x1640   :  { %2192 = vmatprep.subr.bf16.mxu1 %v2469_v6 }
0x170d   :  { %v777_v10 = vpop.f32.mrb[16].mxu1 }
0x170e   :  { %v783_v11 = vadd.f32 %v777_v10, %v735_v9  ;;  %v2166_v12 = vpop.f32.mrb[17].mxu1 }
0x170f   :  { %v780_v13 = vpop.f32.mrb[18].mxu1 }
0x1710   :  { %2333 = vtanh.f32 %v783_v11  ;;  %v2167_v14 = vpop.f32.mrb[19].mxu1 }
0x171a   :  { %v2334_v15 = vpop.eup %2333 }
0x171b   :  { %v785_v16 = vmul.f32 0.5, %v2334_v15 }
0x171d   :  { %v786_v17 = vadd.f32 0.5, %v785_v16 }
0x171f   :  { %v787_v18 = vsel %vm113_vm3, %v786_v17, %v2334_v15  ;;  %v960_v17 = vld [vmem:[#allocation2 + $0xb] sm:$0x1] }
0x1720   :  { %790 = vrot.lane.b32.xlu1 %v787_v18, %s2471_s5  ;;  %v788_v23 = vmul.f32 %v787_v18, %v723_v0 }
0x1792   :  { %v791_v20 = vpop.permute.xlu1 %790 }
0x1793   :  { %v793_v21 = vmul.f32 %v791_v20, %v787_v18 }
0x1795   :  { %795 = vrot.lane.b32.xlu0 %v793_v21, %s2471_s5 }
0x1807   :  { %v796_v24 = vpop.permute.xlu0 %795 }
0x1808   :  { %v798_v25 = vadd.f32 %v796_v24, %v788_v23 }
0x180a   :  { %2335 = vtanh.f32 %v798_v25 }
0x1814   :  { %v2336_v27 = vpop.eup %2335 }
0x1815   :  { %801 = vrot.lane.b32.xlu1 %v2336_v27, %s2471_s5 }
0x1887   :  { %v802_v28 = vpop.permute.xlu1 %801 }
0x1888   :  { %v2723_v29 = vmul.f32 %v802_v28, %v787_v18 }
0x188a   :  { %v811_v30 = vpack.c.bf16 %v2723_v29, %v2723_v29 }
0x188c   :  { %813 = vrot.lane.b32.xlu0 %v811_v30, %s2472_s2 }
0x18fe   :  { %v814_v31 = vpop.permute.xlu0 %813 }
0x18ff   :  { %2173 = vmatmul.mubr.msk.bf16.vlgmr.msra.gmra.mrb[20].mxu0 %vm130_vm2, %v814_v31 }
0x1900   :  { %2185 = vmatpush3.bf16.msra.mxu0 %v2540_v7  ;;  %2188 = vmatprep.mubr.msk.bf16.mxu0 %vm2470_vm1, %v2469_v6 }
0x1901   :  { %2186 = vmatprep.subr.bf16.mxu0 %v2469_v6 }
0x1904   :  { %2187 = vmatpush3.bf16.msra.mxu0 %v2549_v8 }
0x1905   :  { %2200 = vmatprep.subr.bf16.mxu0 %v2469_v6 }
0x19d2   :  { %v852_v33 = vpop.f32.mrb[20].mxu0 }
0x19d3   :  { %v858_v34 = vadd.f32 %v852_v33, %v810_v32  ;;  %v2174_v35 = vpop.f32.mrb[21].mxu0 }
0x19d4   :  { %v855_v36 = vpop.f32.mrb[22].mxu0 }
0x19d5   :  { %2337 = vtanh.f32 %v858_v34  ;;  %v2175_v37 = vpop.f32.mrb[23].mxu0 }
0x19df   :  { %v2338_v38 = vpop.eup %2337 }
0x19e0   :  { %v860_v39 = vmul.f32 0.5, %v2338_v38 }
0x19e2   :  { %v861_v42 = vadd.f32 0.5, %v860_v39 }
0x19e4   :  { %v862_v43 = vsel %vm113_vm3, %v861_v42, %v2338_v38 }
0x19e5   :  { %865 = vrot.lane.b32.xlu1 %v862_v43, %s2471_s5  ;;  %v863_v47 = vmul.f32 %v862_v43, %v798_v25 }
0x1a57   :  { %v866_v44 = vpop.permute.xlu1 %865 }
0x1a58   :  { %v868_v46 = vmul.f32 %v866_v44, %v862_v43 }
0x1a5a   :  { %870 = vrot.lane.b32.xlu0 %v868_v46, %s2471_s5 }
0x1acc   :  { %v871_v48 = vpop.permute.xlu0 %870 }
0x1acd   :  { %v873_v49 = vadd.f32 %v871_v48, %v863_v47 }
0x1acf   :  { %2339 = vtanh.f32 %v873_v49 }
0x1ad9   :  { %v2340_v50 = vpop.eup %2339 }
0x1ada   :  { %876 = vrot.lane.b32.xlu1 %v2340_v50, %s2471_s5 }
0x1b4c   :  { %v877_v51 = vpop.permute.xlu1 %876 }
0x1b4d   :  { %v2740_v52 = vmul.f32 %v877_v51, %v862_v43  ;;  %v1035_v43 = vld [vmem:[#allocation2 + $0xc] sm:$0x1] }
0x1b4f   :  { %v886_v53 = vpack.c.bf16 %v2740_v52, %v2740_v52 }
0x1b51   :  { %888 = vrot.lane.b32.xlu0 %v886_v53, %s2472_s2 }
0x1bc3   :  { %v889_v54 = vpop.permute.xlu0 %888 }
0x1bc4   :  { %2181 = vmatmul.mubr.msk.bf16.vlgmr.msra.gmra.mrb[20].mxu1 %vm130_vm2, %v889_v54 }
0x1bc5   :  { %2193 = vmatpush3.bf16.msra.mxu1 %v2540_v7  ;;  %2196 = vmatprep.mubr.msk.bf16.mxu1 %vm2470_vm1, %v2469_v6 }
0x1bc6   :  { %2194 = vmatprep.subr.bf16.mxu1 %v2469_v6 }
0x1bc9   :  { %2195 = vmatpush3.bf16.msra.mxu1 %v2549_v8 }
0x1bca   :  { %2208 = vmatprep.subr.bf16.mxu1 %v2469_v6 }
0x1c97   :  { %v927_v56 = vpop.f32.mrb[20].mxu1 }
0x1c98   :  { %v933_v57 = vadd.f32 %v927_v56, %v885_v55  ;;  %v2182_v58 = vpop.f32.mrb[21].mxu1 }
0x1c99   :  { %v930_v59 = vpop.f32.mrb[22].mxu1 }
0x1c9a   :  { %2341 = vtanh.f32 %v933_v57  ;;  %v2183_v61 = vpop.f32.mrb[23].mxu1 }
0x1ca4   :  { %v2342_v63 = vpop.eup %2341 }
0x1ca5   :  { %v935_v0 = vmul.f32 0.5, %v2342_v63 }
0x1ca7   :  { %v936_v1 = vadd.f32 0.5, %v935_v0 }
0x1ca9   :  { %v937_v2 = vsel %vm113_vm3, %v936_v1, %v2342_v63 }
0x1caa   :  { %940 = vrot.lane.b32.xlu1 %v937_v2, %s2471_s5  ;;  %v938_v9 = vmul.f32 %v937_v2, %v873_v49 }
0x1d1c   :  { %v941_v4 = vpop.permute.xlu1 %940 }
0x1d1d   :  { %v943_v5 = vmul.f32 %v941_v4, %v937_v2  ;;  %v1110_v4 = vld [vmem:[#allocation2 + $0xd] sm:$0x1] }
0x1d1f   :  { %945 = vrot.lane.b32.xlu0 %v943_v5, %s2471_s5 }
0x1d91   :  { %v946_v10 = vpop.permute.xlu0 %945 }
0x1d92   :  { %v948_v11 = vadd.f32 %v946_v10, %v938_v9 }
0x1d94   :  { %2343 = vtanh.f32 %v948_v11 }
0x1d9e   :  { %v2344_v12 = vpop.eup %2343 }
0x1d9f   :  { %951 = vrot.lane.b32.xlu1 %v2344_v12, %s2471_s5 }
0x1e11   :  { %v952_v13 = vpop.permute.xlu1 %951 }
0x1e12   :  { %v2757_v14 = vmul.f32 %v952_v13, %v937_v2 }
0x1e14   :  { %v961_v15 = vpack.c.bf16 %v2757_v14, %v2757_v14 }
0x1e16   :  { %963 = vrot.lane.b32.xlu0 %v961_v15, %s2472_s2 }
0x1e88   :  { %v964_v16 = vpop.permute.xlu0 %963 }
0x1e89   :  { %2189 = vmatmul.mubr.msk.bf16.vlgmr.msra.gmra.mrb[24].mxu0 %vm130_vm2, %v964_v16 }
0x1e8a   :  { %2201 = vmatpush3.bf16.msra.mxu0 %v2540_v7  ;;  %2204 = vmatprep.mubr.msk.bf16.mxu0 %vm2470_vm1, %v2469_v6 }
0x1e8b   :  { %2202 = vmatprep.subr.bf16.mxu0 %v2469_v6 }
0x1e8e   :  { %2203 = vmatpush3.bf16.msra.mxu0 %v2549_v8 }
0x1e8f   :  { %2216 = vmatprep.subr.bf16.mxu0 %v2469_v6 }
0x1f5c   :  { %v1002_v18 = vpop.f32.mrb[24].mxu0 }
0x1f5d   :  { %v1008_v20 = vadd.f32 %v1002_v18, %v960_v17  ;;  %v2190_v21 = vpop.f32.mrb[25].mxu0 }
0x1f5e   :  { %v1005_v23 = vpop.f32.mrb[26].mxu0 }
0x1f5f   :  { %2345 = vtanh.f32 %v1008_v20  ;;  %v2191_v24 = vpop.f32.mrb[27].mxu0 }
0x1f69   :  { %v2346_v25 = vpop.eup %2345 }
0x1f6a   :  { %v1010_v27 = vmul.f32 0.5, %v2346_v25 }
0x1f6c   :  { %v1011_v28 = vadd.f32 0.5, %v1010_v27 }
0x1f6e   :  { %v1012_v30 = vsel %vm113_vm3, %v1011_v28, %v2346_v25 }
0x1f6f   :  { %1015 = vrot.lane.b32.xlu1 %v1012_v30, %s2471_s5  ;;  %v1013_v33 = vmul.f32 %v1012_v30, %v948_v11 }
0x1fe1   :  { %v1016_v31 = vpop.permute.xlu1 %1015 }
0x1fe2   :  { %v1018_v32 = vmul.f32 %v1016_v31, %v1012_v30 }
0x1fe4   :  { %1020 = vrot.lane.b32.xlu0 %v1018_v32, %s2471_s5  ;;  %v1185_v32 = vld [vmem:[#allocation2 + $0xe] sm:$0x1] }
0x2056   :  { %v1021_v34 = vpop.permute.xlu0 %1020 }
0x2057   :  { %v1023_v35 = vadd.f32 %v1021_v34, %v1013_v33 }
0x2059   :  { %2347 = vtanh.f32 %v1023_v35 }
0x2063   :  { %v2348_v36 = vpop.eup %2347 }
0x2064   :  { %1026 = vrot.lane.b32.xlu1 %v2348_v36, %s2471_s5 }
0x20d6   :  { %v1027_v37 = vpop.permute.xlu1 %1026 }
0x20d7   :  { %v2774_v38 = vmul.f32 %v1027_v37, %v1012_v30 }
0x20d9   :  { %v1036_v39 = vpack.c.bf16 %v2774_v38, %v2774_v38 }
0x20db   :  { %1038 = vrot.lane.b32.xlu0 %v1036_v39, %s2472_s2 }
0x214d   :  { %v1039_v42 = vpop.permute.xlu0 %1038 }
0x214e   :  { %2197 = vmatmul.mubr.msk.bf16.vlgmr.msra.gmra.mrb[24].mxu1 %vm130_vm2, %v1039_v42 }
0x214f   :  { %2209 = vmatpush3.bf16.msra.mxu1 %v2540_v7  ;;  %2212 = vmatprep.mubr.msk.bf16.mxu1 %vm2470_vm1, %v2469_v6 }
0x2150   :  { %2210 = vmatprep.subr.bf16.mxu1 %v2469_v6 }
0x2153   :  { %2211 = vmatpush3.bf16.msra.mxu1 %v2549_v8 }
0x2154   :  { %2224 = vmatprep.subr.bf16.mxu1 %v2469_v6 }
0x2221   :  { %v1077_v44 = vpop.f32.mrb[24].mxu1 }
0x2222   :  { %v1083_v46 = vadd.f32 %v1077_v44, %v1035_v43  ;;  %v2198_v47 = vpop.f32.mrb[25].mxu1 }
0x2223   :  { %v1080_v48 = vpop.f32.mrb[26].mxu1 }
0x2224   :  { %2349 = vtanh.f32 %v1083_v46  ;;  %v2199_v49 = vpop.f32.mrb[27].mxu1 }
0x222e   :  { %v2350_v50 = vpop.eup %2349 }
0x222f   :  { %v1085_v51 = vmul.f32 0.5, %v2350_v50 }
0x2231   :  { %v1086_v53 = vadd.f32 0.5, %v1085_v51 }
0x2233   :  { %v1087_v54 = vsel %vm113_vm3, %v1086_v53, %v2350_v50 }
0x2234   :  { %1090 = vrot.lane.b32.xlu1 %v1087_v54, %s2471_s5  ;;  %v1088_v57 = vmul.f32 %v1087_v54, %v1023_v35 }
0x22a6   :  { %v1091_v55 = vpop.permute.xlu1 %1090 }
0x22a7   :  { %v1093_v56 = vmul.f32 %v1091_v55, %v1087_v54  ;;  %v2834_v55 = vld [vmem:[%s3097_s4] sm:$0xff]  }
0x22a9   :  { %1095 = vrot.lane.b32.xlu0 %v1093_v56, %s2471_s5  ;;  %v2843_v56 = vld [vmem:[%s3097_s4 + $0x8] sm:$0xff]   ;;  %s2473_s4 = smov 96  }
0x231b   :  { %v1096_v58 = vpop.permute.xlu0 %1095 }
0x231c   :  { %v1098_v59 = vadd.f32 %v1096_v58, %v1088_v57  ;;  %v1260_v57 = vld [vmem:[#allocation2 + $0xf] sm:$0x1] }
0x231e   :  { %2351 = vtanh.f32 %v1098_v59 }
0x2328   :  { %v2352_v61 = vpop.eup %2351 }
0x2329   :  { %1101 = vrot.lane.b32.xlu1 %v2352_v61, %s2471_s5 }
0x239b   :  { %v1102_v63 = vpop.permute.xlu1 %1101 }
0x239c   :  { %v2791_v0 = vmul.f32 %v1102_v63, %v1087_v54 }
0x239e   :  { %v1111_v1 = vpack.c.bf16 %v2791_v0, %v2791_v0 }
0x23a0   :  { %1113 = vrot.lane.b32.xlu0 %v1111_v1, %s2472_s2 }
0x2412   :  { %v1114_v2 = vpop.permute.xlu0 %1113 }
0x2413   :  { %2205 = vmatmul.mubr.msk.bf16.vlgmr.msra.gmra.mrb[28].mxu0 %vm130_vm2, %v1114_v2 }
0x2414   :  { %2217 = vmatpush3.bf16.msra.mxu0 %v2540_v7  ;;  %2220 = vmatprep.mubr.msk.bf16.mxu0 %vm2470_vm1, %v2469_v6 }
0x2415   :  { %2218 = vmatprep.subr.bf16.mxu0 %v2469_v6 }
0x2418   :  { %2219 = vmatpush3.bf16.msra.mxu0 %v2549_v8 }
0x2419   :  { %2232 = vmatprep.subr.bf16.mxu0 %v2469_v6 }
0x24e6   :  { %v1152_v5 = vpop.f32.mrb[28].mxu0 }
0x24e7   :  { %v1158_v9 = vadd.f32 %v1152_v5, %v1110_v4  ;;  %v2206_v10 = vpop.f32.mrb[29].mxu0 }
0x24e8   :  { %v1155_v11 = vpop.f32.mrb[30].mxu0 }
0x24e9   :  { %2353 = vtanh.f32 %v1158_v9  ;;  %v2207_v12 = vpop.f32.mrb[31].mxu0 }
0x24f3   :  { %v2354_v13 = vpop.eup %2353 }
0x24f4   :  { %v1160_v15 = vmul.f32 0.5, %v2354_v13 }
0x24f6   :  { %v1161_v16 = vadd.f32 0.5, %v1160_v15 }
0x24f8   :  { %v1162_v17 = vsel %vm113_vm3, %v1161_v16, %v2354_v13 }
0x24f9   :  { %1165 = vrot.lane.b32.xlu1 %v1162_v17, %s2471_s5  ;;  %v1163_v21 = vmul.f32 %v1162_v17, %v1098_v59 }
0x256b   :  { %v1166_v18 = vpop.permute.xlu1 %1165 }
0x256c   :  { %v1168_v20 = vmul.f32 %v1166_v18, %v1162_v17 }
0x256e   :  { %1170 = vrot.lane.b32.xlu0 %v1168_v20, %s2471_s5 }
0x25e0   :  { %v1171_v23 = vpop.permute.xlu0 %1170 }
0x25e1   :  { %v1173_v24 = vadd.f32 %v1171_v23, %v1163_v21  ;;  %v1335_v23 = vld [vmem:[#allocation2 + $0x10] sm:$0x1] }
0x25e3   :  { %2355 = vtanh.f32 %v1173_v24 }
0x25ed   :  { %v2356_v25 = vpop.eup %2355 }
0x25ee   :  { %1176 = vrot.lane.b32.xlu1 %v2356_v25, %s2471_s5 }
0x2660   :  { %v1177_v27 = vpop.permute.xlu1 %1176 }
0x2661   :  { %v2808_v28 = vmul.f32 %v1177_v27, %v1162_v17 }
0x2663   :  { %v1186_v30 = vpack.c.bf16 %v2808_v28, %v2808_v28 }
0x2665   :  { %1188 = vrot.lane.b32.xlu0 %v1186_v30, %s2472_s2 }
0x26d7   :  { %v1189_v31 = vpop.permute.xlu0 %1188 }
0x26d8   :  { %2213 = vmatmul.mubr.msk.bf16.vlgmr.msra.gmra.mrb[28].mxu1 %vm130_vm2, %v1189_v31 }
0x26d9   :  { %2225 = vmatpush3.bf16.msra.mxu1 %v2540_v7  ;;  %2228 = vmatprep.mubr.msk.bf16.mxu1 %vm2470_vm1, %v2469_v6 }
0x26da   :  { %2226 = vmatprep.subr.bf16.mxu1 %v2469_v6 }
0x26dd   :  { %2227 = vmatpush3.bf16.msra.mxu1 %v2549_v8 }
0x26de   :  { %2240 = vmatprep.subr.bf16.mxu1 %v2469_v6 }
0x27ab   :  { %v1227_v33 = vpop.f32.mrb[28].mxu1 }
0x27ac   :  { %v1233_v34 = vadd.f32 %v1227_v33, %v1185_v32  ;;  %v2214_v35 = vpop.f32.mrb[29].mxu1 }
0x27ad   :  { %v1230_v36 = vpop.f32.mrb[30].mxu1 }
0x27ae   :  { %2357 = vtanh.f32 %v1233_v34  ;;  %v2215_v37 = vpop.f32.mrb[31].mxu1 }
0x27b8   :  { %v2358_v39 = vpop.eup %2357 }
0x27b9   :  { %v1235_v42 = vmul.f32 0.5, %v2358_v39 }
0x27bb   :  { %v1236_v43 = vadd.f32 0.5, %v1235_v42 }
0x27bd   :  { %v1237_v7 = vsel %vm113_vm3, %v1236_v43, %v2358_v39 }
0x27be   :  { %1240 = vrot.lane.b32.xlu1 %v1237_v7, %s2471_s5  ;;  %v1238_v8 = vmul.f32 %v1237_v7, %v1173_v24 }
0x2830   :  { %v1241_v44 = vpop.permute.xlu1 %1240 }
0x2831   :  { %v1243_v46 = vmul.f32 %v1241_v44, %v1237_v7 }
0x2833   :  { %1245 = vrot.lane.b32.xlu0 %v1243_v46, %s2471_s5 }
0x28a5   :  { %v1246_v47 = vpop.permute.xlu0 %1245 }
0x28a6   :  { %v1248_v48 = vadd.f32 %v1246_v47, %v1238_v8 }
0x28a8   :  { %2359 = vtanh.f32 %v1248_v48 }
0x28b2   :  { %v2360_v49 = vpop.eup %2359 }
0x28b3   :  { %1251 = vrot.lane.b32.xlu1 %v2360_v49, %s2471_s5 }
0x2925   :  { %v1252_v50 = vpop.permute.xlu1 %1251 }
0x2926   :  { %v2825_v51 = vmul.f32 %v1252_v50, %v1237_v7 }
0x2928   :  { %v1261_v53 = vpack.c.bf16 %v2825_v51, %v2825_v51 }
0x292a   :  { %1263 = vrot.lane.b32.xlu0 %v1261_v53, %s2472_s2 }
0x299c   :  { %v1264_v54 = vpop.permute.xlu0 %1263 }
0x299d   :  { %2221 = vmatmul.mubr.msk.bf16.vlgmr.msra.gmra.mrb[32].mxu0 %vm130_vm2, %v1264_v54 }
0x299e   :  { %2233 = vmatpush3.bf16.msra.mxu0 %v2834_v55  ;;  %2236 = vmatprep.mubr.msk.bf16.mxu0 %vm2470_vm1, %v2469_v6 }
0x299f   :  { %2234 = vmatprep.subr.bf16.mxu0 %v2469_v6 }
0x29a2   :  { %2235 = vmatpush3.bf16.msra.mxu0 %v2843_v56 }
0x29a3   :  { %2248 = vmatprep.subr.bf16.mxu0 %v2469_v6 }
0x2a70   :  { %v1302_v58 = vpop.f32.mrb[32].mxu0 }
0x2a71   :  { %v1308_v59 = vadd.f32 %v1302_v58, %v1260_v57  ;;  %v2222_v61 = vpop.f32.mrb[33].mxu0 }
0x2a72   :  { %v1305_v63 = vpop.f32.mrb[34].mxu0 }
0x2a73   :  { %2361 = vtanh.f32 %v1308_v59  ;;  %v2223_v1 = vpop.f32.mrb[35].mxu0 }
0x2a7d   :  { %v2362_v2 = vpop.eup %2361 }
0x2a7e   :  { %v1310_v4 = vmul.f32 0.5, %v2362_v2 }
0x2a80   :  { %v1311_v5 = vadd.f32 0.5, %v1310_v4 }
0x2a82   :  { %v1312_v9 = vsel %vm113_vm3, %v1311_v5, %v2362_v2 }
0x2a83   :  { %1315 = vrot.lane.b32.xlu1 %v1312_v9, %s2471_s5  ;;  %v1313_v12 = vmul.f32 %v1312_v9, %v1248_v48  ;;  %v1410_v48 = vld [vmem:[#allocation2 + $0x11] sm:$0x1] }
0x2af5   :  { %v1316_v10 = vpop.permute.xlu1 %1315 }
0x2af6   :  { %v1318_v11 = vmul.f32 %v1316_v10, %v1312_v9 }
0x2af8   :  { %1320 = vrot.lane.b32.xlu0 %v1318_v11, %s2471_s5 }
0x2b6a   :  { %v1321_v13 = vpop.permute.xlu0 %1320 }
0x2b6b   :  { %v1323_v15 = vadd.f32 %v1321_v13, %v1313_v12 }
0x2b6d   :  { %2363 = vtanh.f32 %v1323_v15 }
0x2b77   :  { %v2364_v16 = vpop.eup %2363 }
0x2b78   :  { %1326 = vrot.lane.b32.xlu1 %v2364_v16, %s2471_s5  ;;  %v1485_v16 = vld [vmem:[#allocation2 + $0x12] sm:$0x1] }
0x2bea   :  { %v1327_v17 = vpop.permute.xlu1 %1326 }
0x2beb   :  { %v2852_v18 = vmul.f32 %v1327_v17, %v1312_v9 }
0x2bed   :  { %v1336_v20 = vpack.c.bf16 %v2852_v18, %v2852_v18 }
0x2bef   :  { %1338 = vrot.lane.b32.xlu0 %v1336_v20, %s2472_s2 }
0x2c61   :  { %v1339_v21 = vpop.permute.xlu0 %1338 }
0x2c62   :  { %2229 = vmatmul.mubr.msk.bf16.vlgmr.msra.gmra.mrb[32].mxu1 %vm130_vm2, %v1339_v21 }
0x2c63   :  { %2241 = vmatpush3.bf16.msra.mxu1 %v2834_v55  ;;  %2244 = vmatprep.mubr.msk.bf16.mxu1 %vm2470_vm1, %v2469_v6 }
0x2c64   :  { %2242 = vmatprep.subr.bf16.mxu1 %v2469_v6 }
0x2c67   :  { %2243 = vmatpush3.bf16.msra.mxu1 %v2843_v56 }
0x2c68   :  { %2256 = vmatprep.subr.bf16.mxu1 %v2469_v6 }
0x2d35   :  { %v1377_v24 = vpop.f32.mrb[32].mxu1 }
0x2d36   :  { %v1383_v25 = vadd.f32 %v1377_v24, %v1335_v23  ;;  %v2230_v27 = vpop.f32.mrb[33].mxu1 }
0x2d37   :  { %v1380_v30 = vpop.f32.mrb[34].mxu1 }
0x2d38   :  { %2365 = vtanh.f32 %v1383_v25  ;;  %v2231_v31 = vpop.f32.mrb[35].mxu1 }
0x2d42   :  { %v2366_v32 = vpop.eup %2365 }
0x2d43   :  { %v1385_v33 = vmul.f32 0.5, %v2366_v32 }
0x2d45   :  { %v1386_v34 = vadd.f32 0.5, %v1385_v33 }
0x2d47   :  { %v1387_v35 = vsel %vm113_vm3, %v1386_v34, %v2366_v32 }
0x2d48   :  { %1390 = vrot.lane.b32.xlu1 %v1387_v35, %s2471_s5  ;;  %v1388_v39 = vmul.f32 %v1387_v35, %v1323_v15 }
0x2dba   :  { %v1391_v36 = vpop.permute.xlu1 %1390 }
0x2dbb   :  { %v1393_v37 = vmul.f32 %v1391_v36, %v1387_v35 }
0x2dbd   :  { %1395 = vrot.lane.b32.xlu0 %v1393_v37, %s2471_s5 }
0x2e2f   :  { %v1396_v42 = vpop.permute.xlu0 %1395 }
0x2e30   :  { %v1398_v43 = vadd.f32 %v1396_v42, %v1388_v39 }
0x2e32   :  { %2367 = vtanh.f32 %v1398_v43 }
0x2e3c   :  { %v2368_v7 = vpop.eup %2367 }
0x2e3d   :  { %1401 = vrot.lane.b32.xlu1 %v2368_v7, %s2471_s5 }
0x2eaf   :  { %v1402_v44 = vpop.permute.xlu1 %1401 }
0x2eb0   :  { %v2869_v46 = vmul.f32 %v1402_v44, %v1387_v35  ;;  %v1560_v44 = vld [vmem:[#allocation2 + $0x13] sm:$0x1] }
0x2eb2   :  { %v1411_v8 = vpack.c.bf16 %v2869_v46, %v2869_v46 }
0x2eb4   :  { %1413 = vrot.lane.b32.xlu0 %v1411_v8, %s2472_s2 }
0x2f26   :  { %v1414_v47 = vpop.permute.xlu0 %1413 }
0x2f27   :  { %2237 = vmatmul.mubr.msk.bf16.vlgmr.msra.gmra.mrb[36].mxu0 %vm130_vm2, %v1414_v47 }
0x2f28   :  { %2249 = vmatpush3.bf16.msra.mxu0 %v2834_v55  ;;  %2252 = vmatprep.mubr.msk.bf16.mxu0 %vm2470_vm1, %v2469_v6 }
0x2f29   :  { %2250 = vmatprep.subr.bf16.mxu0 %v2469_v6 }
0x2f2c   :  { %2251 = vmatpush3.bf16.msra.mxu0 %v2843_v56 }
0x2f2d   :  { %2264 = vmatprep.subr.bf16.mxu0 %v2469_v6 }
0x2ffa   :  { %v1452_v49 = vpop.f32.mrb[36].mxu0 }
0x2ffb   :  { %v1458_v50 = vadd.f32 %v1452_v49, %v1410_v48  ;;  %v2238_v53 = vpop.f32.mrb[37].mxu0 }
0x2ffc   :  { %v1455_v54 = vpop.f32.mrb[38].mxu0 }
0x2ffd   :  { %2369 = vtanh.f32 %v1458_v50  ;;  %v2239_v57 = vpop.f32.mrb[39].mxu0 }
0x3007   :  { %v2370_v58 = vpop.eup %2369 }
0x3008   :  { %v1460_v59 = vmul.f32 0.5, %v2370_v58 }
0x300a   :  { %v1461_v61 = vadd.f32 0.5, %v1460_v59 }
0x300c   :  { %v1462_v63 = vsel %vm113_vm3, %v1461_v61, %v2370_v58 }
0x300d   :  { %1465 = vrot.lane.b32.xlu1 %v1462_v63, %s2471_s5  ;;  %v1463_v4 = vmul.f32 %v1462_v63, %v1398_v43 }
0x307f   :  { %v1466_v1 = vpop.permute.xlu1 %1465 }
0x3080   :  { %v1468_v2 = vmul.f32 %v1466_v1, %v1462_v63 }
0x3082   :  { %1470 = vrot.lane.b32.xlu0 %v1468_v2, %s2471_s5 }
0x30f4   :  { %v1471_v5 = vpop.permute.xlu0 %1470 }
0x30f5   :  { %v1473_v9 = vadd.f32 %v1471_v5, %v1463_v4 }
0x30f7   :  { %2371 = vtanh.f32 %v1473_v9 }
0x3101   :  { %v2372_v10 = vpop.eup %2371 }
0x3102   :  { %1476 = vrot.lane.b32.xlu1 %v2372_v10, %s2471_s5 }
0x3174   :  { %v1477_v11 = vpop.permute.xlu1 %1476 }
0x3175   :  { %v2886_v12 = vmul.f32 %v1477_v11, %v1462_v63 }
0x3177   :  { %v1486_v13 = vpack.c.bf16 %v2886_v12, %v2886_v12 }
0x3179   :  { %1488 = vrot.lane.b32.xlu0 %v1486_v13, %s2472_s2  ;;  %v1635_v13 = vld [vmem:[#allocation2 + $0x14] sm:$0x1] }
0x31eb   :  { %v1489_v15 = vpop.permute.xlu0 %1488 }
0x31ec   :  { %2245 = vmatmul.mubr.msk.bf16.vlgmr.msra.gmra.mrb[36].mxu1 %vm130_vm2, %v1489_v15 }
0x31ed   :  { %2257 = vmatpush3.bf16.msra.mxu1 %v2834_v55  ;;  %2260 = vmatprep.mubr.msk.bf16.mxu1 %vm2470_vm1, %v2469_v6 }
0x31ee   :  { %2258 = vmatprep.subr.bf16.mxu1 %v2469_v6 }
0x31f1   :  { %2259 = vmatpush3.bf16.msra.mxu1 %v2843_v56 }
0x31f2   :  { %2272 = vmatprep.subr.bf16.mxu1 %v2469_v6 }
0x32bf   :  { %v1527_v17 = vpop.f32.mrb[36].mxu1 }
0x32c0   :  { %v1533_v20 = vadd.f32 %v1527_v17, %v1485_v16  ;;  %v2246_v21 = vpop.f32.mrb[37].mxu1 }
0x32c1   :  { %v1530_v23 = vpop.f32.mrb[38].mxu1 }
0x32c2   :  { %2373 = vtanh.f32 %v1533_v20  ;;  %v2247_v24 = vpop.f32.mrb[39].mxu1 }
0x32cc   :  { %v2374_v25 = vpop.eup %2373 }
0x32cd   :  { %v1535_v27 = vmul.f32 0.5, %v2374_v25 }
0x32cf   :  { %v1536_v30 = vadd.f32 0.5, %v1535_v27 }
0x32d1   :  { %v1537_v31 = vsel %vm113_vm3, %v1536_v30, %v2374_v25 }
0x32d2   :  { %1540 = vrot.lane.b32.xlu1 %v1537_v31, %s2471_s5  ;;  %v1538_v34 = vmul.f32 %v1537_v31, %v1473_v9 }
0x3344   :  { %v1541_v32 = vpop.permute.xlu1 %1540 }
0x3345   :  { %v1543_v33 = vmul.f32 %v1541_v32, %v1537_v31 }
0x3347   :  { %1545 = vrot.lane.b32.xlu0 %v1543_v33, %s2471_s5 }
0x33b9   :  { %v1546_v35 = vpop.permute.xlu0 %1545 }
0x33ba   :  { %v1548_v36 = vadd.f32 %v1546_v35, %v1538_v34 }
0x33bc   :  { %2375 = vtanh.f32 %v1548_v36 }
0x33c6   :  { %v2376_v37 = vpop.eup %2375 }
0x33c7   :  { %1551 = vrot.lane.b32.xlu1 %v2376_v37, %s2471_s5 }
0x3439   :  { %v1552_v39 = vpop.permute.xlu1 %1551 }
0x343a   :  { %v2903_v42 = vmul.f32 %v1552_v39, %v1537_v31 }
0x343c   :  { %v1561_v43 = vpack.c.bf16 %v2903_v42, %v2903_v42 }
0x343e   :  { %1563 = vrot.lane.b32.xlu0 %v1561_v43, %s2472_s2 }
0x34b0   :  { %v1564_v7 = vpop.permute.xlu0 %1563 }
0x34b1   :  { %2253 = vmatmul.mubr.msk.bf16.vlgmr.msra.gmra.mrb[40].mxu0 %vm130_vm2, %v1564_v7  ;;  %v1710_v7 = vld [vmem:[#allocation2 + $0x15] sm:$0x1] }
0x34b2   :  { %2265 = vmatpush3.bf16.msra.mxu0 %v2834_v55  ;;  %2268 = vmatprep.mubr.msk.bf16.mxu0 %vm2470_vm1, %v2469_v6 }
0x34b3   :  { %2266 = vmatprep.subr.bf16.mxu0 %v2469_v6 }
0x34b6   :  { %2267 = vmatpush3.bf16.msra.mxu0 %v2843_v56 }
0x34b7   :  { %2280 = vmatprep.subr.bf16.mxu0 %v2469_v6 }
0x3584   :  { %v1602_v8 = vpop.f32.mrb[40].mxu0 }
0x3585   :  { %v1608_v47 = vadd.f32 %v1602_v8, %v1560_v44  ;;  %v2254_v48 = vpop.f32.mrb[41].mxu0 }
0x3586   :  { %v1605_v49 = vpop.f32.mrb[42].mxu0 }
0x3587   :  { %2377 = vtanh.f32 %v1608_v47  ;;  %v2255_v50 = vpop.f32.mrb[43].mxu0 }
0x3591   :  { %v2378_v53 = vpop.eup %2377 }
0x3592   :  { %v1610_v54 = vmul.f32 0.5, %v2378_v53 }
0x3594   :  { %v1611_v57 = vadd.f32 0.5, %v1610_v54 }
0x3596   :  { %v1612_v58 = vsel %vm113_vm3, %v1611_v57, %v2378_v53 }
0x3597   :  { %1615 = vrot.lane.b32.xlu1 %v1612_v58, %s2471_s5  ;;  %v1613_v63 = vmul.f32 %v1612_v58, %v1548_v36 }
0x3609   :  { %v1616_v59 = vpop.permute.xlu1 %1615 }
0x360a   :  { %v1618_v61 = vmul.f32 %v1616_v59, %v1612_v58 }
0x360c   :  { %1620 = vrot.lane.b32.xlu0 %v1618_v61, %s2471_s5 }
0x367e   :  { %v1621_v1 = vpop.permute.xlu0 %1620 }
0x367f   :  { %v1623_v2 = vadd.f32 %v1621_v1, %v1613_v63 }
0x3681   :  { %2379 = vtanh.f32 %v1623_v2 }
0x368b   :  { %v2380_v4 = vpop.eup %2379 }
0x368c   :  { %1626 = vrot.lane.b32.xlu1 %v2380_v4, %s2471_s5 }
0x36fe   :  { %v1627_v5 = vpop.permute.xlu1 %1626 }
0x36ff   :  { %v2920_v9 = vmul.f32 %v1627_v5, %v1612_v58  ;;  %v1785_v5 = vld [vmem:[#allocation2 + $0x16] sm:$0x1] }
0x3701   :  { %v1636_v10 = vpack.c.bf16 %v2920_v9, %v2920_v9 }
0x3703   :  { %1638 = vrot.lane.b32.xlu0 %v1636_v10, %s2472_s2 }
0x3775   :  { %v1639_v11 = vpop.permute.xlu0 %1638 }
0x3776   :  { %2261 = vmatmul.mubr.msk.bf16.vlgmr.msra.gmra.mrb[40].mxu1 %vm130_vm2, %v1639_v11 }
0x3777   :  { %2273 = vmatpush3.bf16.msra.mxu1 %v2834_v55  ;;  %2276 = vmatprep.mubr.msk.bf16.mxu1 %vm2470_vm1, %v2469_v6 }
0x3778   :  { %2274 = vmatprep.subr.bf16.mxu1 %v2469_v6 }
0x377b   :  { %2275 = vmatpush3.bf16.msra.mxu1 %v2843_v56 }
0x3849   :  { %v1677_v15 = vpop.f32.mrb[40].mxu1 }
0x384a   :  { %v1683_v16 = vadd.f32 %v1677_v15, %v1635_v13  ;;  %v2262_v17 = vpop.f32.mrb[41].mxu1 }
0x384b   :  { %v1680_v20 = vpop.f32.mrb[42].mxu1 }
0x384c   :  { %2381 = vtanh.f32 %v1683_v16  ;;  %v2263_v21 = vpop.f32.mrb[43].mxu1 }
0x3856   :  { %v2382_v23 = vpop.eup %2381 }
0x3857   :  { %v1685_v24 = vmul.f32 0.5, %v2382_v23 }
0x3859   :  { %v1686_v25 = vadd.f32 0.5, %v1685_v24 }
0x385b   :  { %v1687_v27 = vsel %vm113_vm3, %v1686_v25, %v2382_v23 }
0x385c   :  { %1690 = vrot.lane.b32.xlu1 %v1687_v27, %s2471_s5  ;;  %v1688_v32 = vmul.f32 %v1687_v27, %v1623_v2 }
0x38ce   :  { %v1691_v30 = vpop.permute.xlu1 %1690 }
0x38cf   :  { %v1693_v31 = vmul.f32 %v1691_v30, %v1687_v27 }
0x38d1   :  { %1695 = vrot.lane.b32.xlu0 %v1693_v31, %s2471_s5 }
0x3943   :  { %v1696_v33 = vpop.permute.xlu0 %1695 }
0x3944   :  { %v1698_v34 = vadd.f32 %v1696_v33, %v1688_v32 }
0x3946   :  { %2383 = vtanh.f32 %v1698_v34 }
0x3950   :  { %v2384_v35 = vpop.eup %2383 }
0x3951   :  { %1701 = vrot.lane.b32.xlu1 %v2384_v35, %s2471_s5 }
0x39c3   :  { %v1702_v36 = vpop.permute.xlu1 %1701 }
0x39c4   :  { %v2936_v37 = vmul.f32 %v1702_v36, %v1687_v27 }
0x39c6   :  { %v1711_v39 = vpack.c.bf16 %v2936_v37, %v2936_v37 }
0x39c8   :  { %1713 = vrot.lane.b32.xlu0 %v1711_v39, %s2472_s2  ;;  %v1860_v39 = vld [vmem:[#allocation2 + $0x17] sm:$0x1] }
0x3a3a   :  { %v1714_v43 = vpop.permute.xlu0 %1713 }
0x3a3b   :  { %2269 = vmatmul.mubr.msk.bf16.vlgmr.msra.gmra.mrb[44].mxu0 %vm130_vm2, %v1714_v43 }
0x3a3c   :  { %2281 = vmatpush3.bf16.msra.mxu0 %v2834_v55  ;;  %2284 = vmatprep.mubr.msk.bf16.mxu0 %vm2470_vm1, %v2469_v6 }
0x3a3d   :  { %2282 = vmatprep.subr.bf16.mxu0 %v2469_v6 }
0x3a40   :  { %2283 = vmatpush3.bf16.msra.mxu0 %v2843_v56 }
0x3b0e   :  { %v1752_v44 = vpop.f32.mrb[44].mxu0 }
0x3b0f   :  { %v1758_v8 = vadd.f32 %v1752_v44, %v1710_v7  ;;  %v2270_v47 = vpop.f32.mrb[45].mxu0 }
0x3b10   :  { %v1755_v48 = vpop.f32.mrb[46].mxu0 }
0x3b11   :  { %2385 = vtanh.f32 %v1758_v8  ;;  %v2271_v49 = vpop.f32.mrb[47].mxu0 }
0x3b1b   :  { %v2386_v50 = vpop.eup %2385 }
0x3b1c   :  { %v1760_v53 = vmul.f32 0.5, %v2386_v50 }
0x3b1e   :  { %v1761_v54 = vadd.f32 0.5, %v1760_v53 }
0x3b20   :  { %v1762_v55 = vsel %vm113_vm3, %v1761_v54, %v2386_v50 }
0x3b21   :  { %1765 = vrot.lane.b32.xlu1 %v1762_v55, %s2471_s5  ;;  %v1763_v6 = vmul.f32 %v1762_v55, %v1698_v34 }
0x3b93   :  { %v1766_v57 = vpop.permute.xlu1 %1765 }
0x3b94   :  { %v1768_v58 = vmul.f32 %v1766_v57, %v1762_v55 }
0x3b96   :  { %1770 = vrot.lane.b32.xlu0 %v1768_v58, %s2471_s5 }
0x3c08   :  { %v1771_v56 = vpop.permute.xlu0 %1770 }
0x3c09   :  { %v1773_v59 = vadd.f32 %v1771_v56, %v1763_v6 }
0x3c0b   :  { %2387 = vtanh.f32 %v1773_v59 }
0x3c15   :  { %v2388_v61 = vpop.eup %2387 }
0x3c16   :  { %1776 = vrot.lane.b32.xlu1 %v2388_v61, %s2471_s5 }
0x3c88   :  { %v1777_v63 = vpop.permute.xlu1 %1776 }
0x3c89   :  { %v1779_v1 = vmul.f32 %v1777_v63, %v1762_v55 }
0x3c8b   :  { %v1786_v2 = vpack.c.bf16 %v1779_v1, %v1779_v1 }
0x3c8d   :  { %1788 = vrot.lane.b32.xlu0 %v1786_v2, %s2472_s2 }
0x3cff   :  { %v1789_v4 = vpop.permute.xlu0 %1788 }
0x3d00   :  { %2277 = vmatmul.mubr.msk.bf16.vlgmr.msra.gmra.mrb[44].mxu1 %vm130_vm2, %v1789_v4 }
0x3dd3   :  { %v1827_v10 = vpop.f32.mrb[44].mxu1 }
0x3dd4   :  { %v1833_v11 = vadd.f32 %v1827_v10, %v1785_v5  ;;  %v2278_v13 = vpop.f32.mrb[45].mxu1 }
0x3dd5   :  { %v1830_v15 = vpop.f32.mrb[46].mxu1 }
0x3dd6   :  { %2389 = vtanh.f32 %v1833_v11  ;;  %v2279_v16 = vpop.f32.mrb[47].mxu1 }
0x3de0   :  { %v2390_v17 = vpop.eup %2389 }
0x3de1   :  { %v1835_v20 = vmul.f32 0.5, %v2390_v17 }
0x3de3   :  { %v1836_v21 = vadd.f32 0.5, %v1835_v20 }
0x3de5   :  { %v1837_v23 = vsel %vm113_vm3, %v1836_v21, %v2390_v17 }
0x3de6   :  { %1840 = vrot.lane.b32.xlu1 %v1837_v23, %s2471_s5  ;;  %v1838_v27 = vmul.f32 %v1837_v23, %v1773_v59 }
0x3e58   :  { %v1841_v24 = vpop.permute.xlu1 %1840 }
0x3e59   :  { %v1843_v25 = vmul.f32 %v1841_v24, %v1837_v23 }
0x3e5b   :  { %1845 = vrot.lane.b32.xlu0 %v1843_v25, %s2471_s5 }
0x3ecd   :  { %v1846_v30 = vpop.permute.xlu0 %1845 }
0x3ece   :  { %v1848_v31 = vadd.f32 %v1846_v30, %v1838_v27 }
0x3ed0   :  { %2391 = vtanh.f32 %v1848_v31 }
0x3eda   :  { %v2392_v32 = vpop.eup %2391 }
0x3edb   :  { %1851 = vrot.lane.b32.xlu1 %v2392_v32, %s2471_s5 }
0x3f4d   :  { %v1852_v33 = vpop.permute.xlu1 %1851 }
0x3f4e   :  { %v2959_v34 = vmul.f32 %v1852_v33, %v1837_v23 }
0x3f50   :  { %v1861_v35 = vpack.c.bf16 %v2959_v34, %v2959_v34 }
0x3f52   :  { %1863 = vrot.lane.b32.xlu0 %v1861_v35, %s2472_s2 }
0x3fc4   :  { %v1864_v36 = vpop.permute.xlu0 %1863 }
0x3fc5   :  { %2285 = vmatmul.mubr.msk.bf16.vlgmr.msra.gmra.mrb[48].mxu0 %vm130_vm2, %v1864_v36 }
0x4098   :  { %v1902_v43 = vpop.f32.mrb[48].mxu0 }
0x4099   :  { %v1908_v7 = vadd.f32 %v1902_v43, %v1860_v39  ;;  %v2286_v44 = vpop.f32.mrb[49].mxu0 }
0x409a   :  { %v1905_v8 = vpop.f32.mrb[50].mxu0 }
0x409b   :  { %2393 = vtanh.f32 %v1908_v7  ;;  %v2287_v47 = vpop.f32.mrb[51].mxu0 }
0x40a5   :  { %v2394_v48 = vpop.eup %2393 }
0x40a6   :  { %v1910_v49 = vmul.f32 0.5, %v2394_v48 }
0x40a8   :  { %v1911_v50 = vadd.f32 0.5, %v1910_v49 }
0x40aa   :  { %v1912_v53 = vsel %vm113_vm3, %v1911_v50, %v2394_v48 }
0x40ab   :  { %1915 = vrot.lane.b32.xlu1 %v1912_v53, %s2471_s5  ;;  %v1913_v26 = vmul.f32 %v1912_v53, %v1848_v31 }
0x411d   :  { %v1916_v54 = vpop.permute.xlu1 %1915 }
0x411e   :  { %v1918_v55 = vmul.f32 %v1916_v54, %v1912_v53 }
0x4120   :  { %1920 = vrot.lane.b32.xlu0 %v1918_v55, %s2471_s5 }
0x4124   :  { %281 = vrot.lane.b32.xlu0 %v2604_v60, %s2472_s2 }
0x4128   :  { %431 = vrot.lane.b32.xlu0 %v2638_v41, %s2472_s2 }
0x412c   :  { %581 = vrot.lane.b32.xlu0 %v2672_v22, %s2472_s2 }
0x4130   :  { %731 = vrot.lane.b32.xlu0 %v2706_v3, %s2472_s2 }
0x4134   :  { %881 = vrot.lane.b32.xlu0 %v2740_v52, %s2472_s2 }
0x4138   :  { %1031 = vrot.lane.b32.xlu0 %v2774_v38, %s2472_s2 }
0x413c   :  { %1181 = vrot.lane.b32.xlu0 %v2808_v28, %s2472_s2 }
0x4140   :  { %1331 = vrot.lane.b32.xlu0 %v2852_v18, %s2472_s2 }
0x4144   :  { %1481 = vrot.lane.b32.xlu0 %v2886_v12, %s2472_s2 }
0x4148   :  { %1631 = vrot.lane.b32.xlu0 %v2920_v9, %s2472_s2 }
0x414c   :  { %1781 = vrot.lane.b32.xlu0 %v1779_v1, %s2472_s2 }
0x4192   :  { %v1921_v60 = vpop.permute.xlu0 %1920 }
0x4193   :  { %v1923_v41 = vadd.f32 %v1921_v60, %v1913_v26 }
0x4195   :  { %2395 = vtanh.f32 %v1923_v41 }
0x4196   :  { %v282_v22 = vpop.permute.xlu0 %281 }
0x4197   :  { %284 = vst.msk [vmem:[#allocation3 + $0x1] sm:$0x1] %vm208_vm4, %v282_v22 }
0x419a   :  { %v432_v3 = vpop.permute.xlu0 %431 }
0x419b   :  { %434 = vst.msk [vmem:[#allocation3 + $0x3] sm:$0x1] %vm208_vm4, %v432_v3 }
0x419e   :  { %v582_v52 = vpop.permute.xlu0 %581 }
0x419f   :  { %v2396_v38 = vpop.eup %2395  ;;  %584 = vst.msk [vmem:[#allocation3 + $0x5] sm:$0x1] %vm208_vm4, %v582_v52 }
0x41a0   :  { %1926 = vrot.lane.b32.xlu1 %v2396_v38, %s2471_s5 }
0x41a2   :  { %v732_v28 = vpop.permute.xlu0 %731 }
0x41a3   :  { %734 = vst.msk [vmem:[#allocation3 + $0x7] sm:$0x1] %vm208_vm4, %v732_v28 }
0x41a4   :  { %205 = vrot.lane.b32.xlu1 %v2587_v40, %s2472_s2 }
0x41a6   :  { %v882_v18 = vpop.permute.xlu0 %881 }
0x41a7   :  { %884 = vst.msk [vmem:[#allocation3 + $0x9] sm:$0x1] %vm208_vm4, %v882_v18 }
0x41a8   :  { %356 = vrot.lane.b32.xlu1 %v2621_v19, %s2472_s2 }
0x41aa   :  { %v1032_v12 = vpop.permute.xlu0 %1031 }
0x41ab   :  { %1034 = vst.msk [vmem:[#allocation3 + $0xb] sm:$0x1] %vm208_vm4, %v1032_v12 }
0x41ac   :  { %506 = vrot.lane.b32.xlu1 %v2655_v62, %s2472_s2 }
0x41ae   :  { %v1182_v9 = vpop.permute.xlu0 %1181 }
0x41af   :  { %1184 = vst.msk [vmem:[#allocation3 + $0xd] sm:$0x1] %vm208_vm4, %v1182_v9 }
0x41b0   :  { %656 = vrot.lane.b32.xlu1 %v2689_v45, %s2472_s2 }
0x41b2   :  { %v1332_v57 = vpop.permute.xlu0 %1331 }
0x41b3   :  { %1334 = vst.msk [vmem:[#allocation3 + $0xf] sm:$0x1] %vm208_vm4, %v1332_v57 }
0x41b4   :  { %806 = vrot.lane.b32.xlu1 %v2723_v29, %s2472_s2 }
0x41b6   :  { %v1482_v40 = vpop.permute.xlu0 %1481 }
0x41b7   :  { %1484 = vst.msk [vmem:[#allocation3 + $0x11] sm:$0x1] %vm208_vm4, %v1482_v40 }
0x41b8   :  { %956 = vrot.lane.b32.xlu1 %v2757_v14, %s2472_s2 }
0x41ba   :  { %v1632_v19 = vpop.permute.xlu0 %1631 }
0x41bb   :  { %1634 = vst.msk [vmem:[#allocation3 + $0x13] sm:$0x1] %vm208_vm4, %v1632_v19 }
0x41bc   :  { %1106 = vrot.lane.b32.xlu1 %v2791_v0, %s2472_s2 }
0x41be   :  { %v1782_v62 = vpop.permute.xlu0 %1781 }
0x41bf   :  { %1784 = vst.msk [vmem:[#allocation3 + $0x15] sm:$0x1] %vm208_vm4, %v1782_v62 }
0x41c0   :  { %1256 = vrot.lane.b32.xlu1 %v2825_v51, %s2472_s2 }
0x41c4   :  { %1406 = vrot.lane.b32.xlu1 %v2869_v46, %s2472_s2 }
0x41c8   :  { %1556 = vrot.lane.b32.xlu1 %v2903_v42, %s2472_s2 }
0x41cc   :  { %1706 = vrot.lane.b32.xlu1 %v2936_v37, %s2472_s2 }
0x41d0   :  { %1856 = vrot.lane.b32.xlu1 %v2959_v34, %s2472_s2 }
0x4212   :  { %v1927_v45 = vpop.permute.xlu1 %1926 }
0x4213   :  { %v1929_v29 = vmul.f32 %v1927_v45, %v1912_v53 }
0x4215   :  { %1931 = vrot.lane.b32.xlu0 %v1929_v29, %s2472_s2 }
0x4216   :  { %v206_v14 = vpop.permute.xlu1 %205 }
0x4217   :  { %209 = vst.msk [vmem:[#allocation3] sm:$0x1] %vm208_vm4, %v206_v14 }
0x4219   :  { %1937 = vrot.lane.b32.xlu0 %v1923_v41, %s2473_s4 }
0x421a   :  { %v357_v0 = vpop.permute.xlu1 %356 }
0x421b   :  { %359 = vst.msk [vmem:[#allocation3 + $0x2] sm:$0x1] %vm208_vm4, %v357_v0 }
0x421e   :  { %v507_v51 = vpop.permute.xlu1 %506 }
0x421f   :  { %509 = vst.msk [vmem:[#allocation3 + $0x4] sm:$0x1] %vm208_vm4, %v507_v51 }
0x4222   :  { %v657_v46 = vpop.permute.xlu1 %656 }
0x4223   :  { %659 = vst.msk [vmem:[#allocation3 + $0x6] sm:$0x1] %vm208_vm4, %v657_v46 }
0x4226   :  { %v807_v42 = vpop.permute.xlu1 %806 }
0x4227   :  { %809 = vst.msk [vmem:[#allocation3 + $0x8] sm:$0x1] %vm208_vm4, %v807_v42 }
0x422a   :  { %v957_v37 = vpop.permute.xlu1 %956 }
0x422b   :  { %959 = vst.msk [vmem:[#allocation3 + $0xa] sm:$0x1] %vm208_vm4, %v957_v37 }
0x422e   :  { %v1107_v58 = vpop.permute.xlu1 %1106 }
0x422f   :  { %1109 = vst.msk [vmem:[#allocation3 + $0xc] sm:$0x1] %vm208_vm4, %v1107_v58 }
0x4232   :  { %v1257_v6 = vpop.permute.xlu1 %1256 }
0x4233   :  { %1259 = vst.msk [vmem:[#allocation3 + $0xe] sm:$0x1] %vm208_vm4, %v1257_v6 }
0x4236   :  { %v1407_v56 = vpop.permute.xlu1 %1406 }
0x4237   :  { %1409 = vst.msk [vmem:[#allocation3 + $0x10] sm:$0x1] %vm208_vm4, %v1407_v56 }
0x423a   :  { %v1557_v59 = vpop.permute.xlu1 %1556 }
0x423b   :  { %1559 = vst.msk [vmem:[#allocation3 + $0x12] sm:$0x1] %vm208_vm4, %v1557_v59 }
0x423e   :  { %v1707_v61 = vpop.permute.xlu1 %1706 }
0x423f   :  { %1709 = vst.msk [vmem:[#allocation3 + $0x14] sm:$0x1] %vm208_vm4, %v1707_v61 }
0x4242   :  { %v1857_v63 = vpop.permute.xlu1 %1856 }
0x4243   :  { %1859 = vst.msk [vmem:[#allocation3 + $0x16] sm:$0x1] %vm208_vm4, %v1857_v63 }
0x4287   :  { %v1932_v1 = vpop.permute.xlu0 %1931 }
0x4288   :  { %1934 = vst.msk [vmem:[#allocation3 + $0x17] sm:$0x1] %vm208_vm4, %v1932_v1  ;;  %1935 = vst.msk [vmem:[#allocation5] sm:$0x1] %vm208_vm4, %v1932_v1 }
0x4289   :  { %2410 = shalt.err (!%p2407_p4)
}
0x428a   :  { %s2411_s12 = scalar_lea.hbm %s3100_s7, 16 }
0x428b   :  { %p2412_p5 = scmp.ne.s32.totalorder %s3100_s7, %s2411_s12  ;;  %p2415_p6 = scmp.lt.u32.totalorder %s2411_s12, %s3100_s7 }
0x428d   :  { %p2417_p7 = pnand %p2415_p6, %p2412_p5 }
0x428f   :  { %2420 = shalt.err (!%p2417_p7)
}
0x4290   :  { %1962 = dma.vmem_to_hbm [thread:$0]  %s1960_s25, 16, %s3100_s7, [#allocation6]  }
0x4291   :  { %s2421_s1 = scalar_lea.vmem %s3039_s27, 384  ;;  %p2426_p9 = scmp.lt.s32.totalorder %s3039_s27, %s3039_s27 }
0x4292   :  { %p2422_p8 = scmp.ne.s32.totalorder %s3039_s27, %s2421_s1  ;;  %p2427_p10 = scmp.lt.s32.totalorder %s2421_s1, %s2421_s1 }
0x4294   :  { %p2428_p11 = por %p2427_p10, %p2426_p9 }
0x4296   :  { %p2429_p12 = pnand %p2428_p11, %p2422_p8 }
0x4298   :  { %2432 = shalt.err (!%p2429_p12)
}
0x4299   :  { %s2433_s18 = scalar_lea.hbm %s3099_s6, 384 }
0x429a   :  { %p2434_p13 = scmp.ne.s32.totalorder %s3099_s6, %s2433_s18  ;;  %p2437_p0 = scmp.lt.u32.totalorder %s2433_s18, %s3099_s6 }
0x429c   :  { %p2439_p1 = pnand %p2437_p0, %p2434_p13 }
0x429e   :  { %2442 = shalt.err (!%p2439_p1)
}
0x429f   :  { %s2477_s7 = smov 128   ;;  %s2478_s22 = smov 8   ;;  %v1938_v2 = vpop.permute.xlu0 %1937 }
0x42a0   :  { %1952 = dma.vmem_to_hbm [thread:$0]  %s3039_s27, 384, %s3099_s6, [#allocation4], %s2477_s7, %s2477_s7, %s2478_s22   ;;  %1940 = vst.msk [vmem:[#allocation7] sm:$0x1] %vm208_vm4, %v1938_v2 }
0x42a1   :  { %s2443_s24 = scalar_lea.vmem %s3043_s29, 16  ;;  %s2447_s25 = scalar_lea.vmem %s3043_s29, 32 }
0x42a2   :  { %p2444_p2 = scmp.ne.s32.totalorder %s3043_s29, %s2443_s24  ;;  %p2448_p3 = scmp.lt.s32.totalorder %s3043_s29, %s3043_s29 }
0x42a3   :  { %p2449_p4 = scmp.lt.s32.totalorder %s2447_s25, %s2443_s24 }
0x42a5   :  { %p2450_p5 = por %p2449_p4, %p2448_p3 }
0x42a7   :  { %p2451_p6 = pnand %p2450_p5, %p2444_p2 }
0x42a9   :  { %2454 = shalt.err (!%p2451_p6)
}
0x42aa   :  { %s2455_s30 = scalar_lea.hbm %s3101_s8, 16 }
0x42ab   :  { %p2456_p7 = scmp.ne.s32.totalorder %s3101_s8, %s2455_s30  ;;  %p2459_p8 = scmp.lt.u32.totalorder %s2455_s30, %s3101_s8 }
0x42ad   :  { %p2461_p9 = pnand %p2459_p8, %p2456_p7 }
0x42af   :  { %2464 = shalt.err (!%p2461_p9)
}
0x42b0   :  { %1972 = dma.vmem_to_hbm [thread:$0]  %s3043_s29, 16, %s3101_s8, [#allocation6]  }
0x42b1   :  { %2465 = dma.done.wait [#allocation4], 384  }
0x42b2   :  { %2466 = vsyncadd [#allocation4], 4294966912 }
0x42b3   :  { %2467 = dma.done.wait [#allocation6], 32  }
0x42b4   :  { %2468 = vsyncadd [#allocation6], 4294967264 }
0x42b5   :  { %1982 = vsyncpa [#allocation4], 1 }
0x42b6   :  { %1983 = vsyncpa [#allocation6], 1 }

</bundles_post_ra>
